<compile_context>
chip_gen: v6e
topology: v6e:2x2x1
jax: 0.10.0
libtpu: 0.0.40
codegen_flags: <defaults>
</compile_context>

<pallas_src>
import functools

import jax
import jax.numpy as jnp
from jax.experimental import pallas as pl
from jax.experimental.pallas import tpu as pltpu


def _geometry(h, w):
    """Lane geometry for the gapped layout.

    Each image occupies MG = M + G lanes: M = H*W real pixels followed by a
    G-wide zero gap (G >= W+1 so vertical taps of neighbouring images read
    zeros; MG is a multiple of 128 so every image start is lane-aligned).
    PADL/PADR are the 128-aligned (>= W+1) zero pads at both ends.
    """
    m = h * w
    g = (-m) % 128
    while g < w + 1:
        g += 128
    pad = 128
    while pad < w + 1:
        pad += 128
    return m, g, pad


# ---------------------------------------------------------------------------
# Fused kernel: conv1+BN+ReLU -> conv2+BN (+ 1x1 downsample+BN) -> add -> PReLU
# ---------------------------------------------------------------------------
def _basic_block_kernel(x_ref, w1_ref, s1_ref, b1_ref,
                        w2_ref, s2_ref, b2d_ref, alpha_ref,
                        o_ref,
                        xpad_ref, xtaps_ref, y1pad_ref, ytaps_ref,
                        *, H, W, NB, G, PADL):
    M = H * W
    MG = M + G
    NT = NB * MG                       # lane width of tap stacks / accumulators
    f32 = jnp.float32
    bf16 = jnp.bfloat16
    cin = x_ref.shape[1]
    cmid = s1_ref.shape[0]

    # ---- hoisted column-validity masks, shared by both 3x3 convs ----------
    pix = jax.lax.broadcasted_iota(jnp.int32, (1, NT), 1)
    col = (pix % MG) % W               # in-image column of every lane
    not_left = col >= 1                # kx==0 taps invalid in image column 0
    not_right = col <= W - 2           # kx==2 taps invalid in image column W-1
    # Row / image boundaries need no mask: >=W+1 zero lanes sit before,
    # between and after the images, so vertical shifts read zeros.

    # ---- zero ONLY the pad/gap lanes of the padded scratches ---------------
    # Unconditional every step: under a "parallel" grid each core owns its own
    # scratch, so gating this on program_id()==0 would be wrong.
    def zero_cols(ref, lo, hi):
        ref[:, lo:hi] = jnp.zeros((ref.shape[0], hi - lo), ref.dtype)

    for ref in (xpad_ref, y1pad_ref):
        zero_cols(ref, 0, PADL)                        # left pad
        zero_cols(ref, PADL + NT, PADL + NT + PADL)    # right pad
        for b in range(NB):
            lo = PADL + b * MG + M
            zero_cols(ref, lo, lo + G)                 # inter-image gap

    # ---- stage x (real columns only) into the padded f32 buffer ------------
    for b in range(NB):
        off = PADL + b * MG
        xpad_ref[:, off:off + M] = x_ref[b]

    # ---- tap staging: 9 shifted ref slices -> one (9*C, NT) stack ----------
    # Masking stays in f32 (v5e has no bf16 VPU); the bf16 cast happens only
    # on the MXU operand read below.
    def stage_taps(src_pad_ref, dst_ref, c):
        for t in range(9):
            ky, kx = divmod(t, 3)
            d = (ky - 1) * W + (kx - 1)
            v = src_pad_ref[:, PADL + d:PADL + d + NT]        # f32 (c, NT)
            if kx == 0:
                v = jnp.where(not_left, v, 0.0)
            elif kx == 2:
                v = jnp.where(not_right, v, 0.0)
            dst_ref[t * c:(t + 1) * c, :] = v

    # ---- conv1: ONE deep-K GEMM, f32 BN scale + bias, ReLU ------------------
    stage_taps(xpad_ref, xtaps_ref, cin)
    acc1 = jnp.dot(w1_ref[...], xtaps_ref[...].astype(bf16),
                   preferred_element_type=f32)                # (cmid, NT)
    y1 = jnp.maximum(acc1 * s1_ref[...] + b1_ref[...], 0.0)

    # ---- y1 never leaves the chip: stage its real columns for conv2 --------
    for b in range(NB):
        off = PADL + b * MG
        y1pad_ref[:, off:off + M] = y1[:, b * MG:b * MG + M]

    # ---- conv2 + 1x1 downsample merged into ONE GEMM ------------------------
    stage_taps(y1pad_ref, ytaps_ref, cmid)
    ytaps_ref[9 * cmid:9 * cmid + cin, :] = xpad_ref[:, PADL:PADL + NT]
    acc2 = jnp.dot(w2_ref[...], ytaps_ref[...].astype(bf16),
                   preferred_element_type=f32)                # (cout, NT)
    z = acc2 * s2_ref[...] + b2d_ref[...]

    # ---- PReLU (scalar alpha from SMEM) + lane-dense per-image stores -------
    alpha = alpha_ref[0]
    z = jnp.where(z >= 0.0, z, alpha * z)
    for b in range(NB):
        o_ref[b] = z[:, b * MG:b * MG + M].astype(o_ref.dtype)


# ---------------------------------------------------------------------------
# pallas_call wrapper
# ---------------------------------------------------------------------------
def basic_block_forward(x_nchw, params, *, stride=1, batch_block=None,
                        out_dtype=jnp.bfloat16):
    """Forward of BasicBolock (stride=1, downsampling=True), NCHW in/out."""
    # Tap/guard-band scheme and the 1x1 residual assume stride == 1.
    assert stride == 1, "fused BasicBolock kernel supports stride=1 only"
    n, cin, h, w = x_nchw.shape
    cmid = params["s1"].shape[0]
    cout = params["s2"].shape[0]

    m, g, padl = _geometry(h, w)
    nb = n if batch_block is None else batch_block    # v7x: pass ceil(n/2)
    assert n % nb == 0
    mg = m + g
    nt = nb * mg
    pw = padl + nt + padl

    # NCHW is already channels-major: this reshape is free.  Keep f32 so all
    # in-kernel elementwise work is f32; bf16 only at the MXU operands.
    xf = x_nchw.reshape(n, cin, m).astype(jnp.float32)

    kernel = functools.partial(_basic_block_kernel,
                               H=h, W=w, NB=nb, G=g, PADL=padl)
    out = pl.pallas_call(
        kernel,
        out_shape=jax.ShapeDtypeStruct((n, cout, m), out_dtype),
        grid=(n // nb,),
        in_specs=[
            pl.BlockSpec((nb, cin, m), lambda i: (i, 0, 0)),          # x
            pl.BlockSpec((cmid, 9 * cin), lambda i: (0, 0)),          # w1
            pl.BlockSpec((cmid, 1), lambda i: (0, 0)),                # s1
            pl.BlockSpec((cmid, 1), lambda i: (0, 0)),                # b1
            pl.BlockSpec((cout, 9 * cmid + cin), lambda i: (0, 0)),   # w2|wd
            pl.BlockSpec((cout, 1), lambda i: (0, 0)),                # s2
            pl.BlockSpec((cout, 1), lambda i: (0, 0)),                # b2+bd
            pl.BlockSpec(memory_space=pltpu.MemorySpace.SMEM),        # alpha
        ],
        out_specs=pl.BlockSpec((nb, cout, m), lambda i: (i, 0, 0)),
        scratch_shapes=[
            pltpu.VMEM((cin, pw), jnp.float32),              # padded x
            pltpu.VMEM((9 * cin, nt), jnp.float32),          # conv1 tap stack
            pltpu.VMEM((cmid, pw), jnp.float32),             # padded y1
            pltpu.VMEM((9 * cmid + cin, nt), jnp.float32),   # conv2 tap stack
        ],
        compiler_params=pltpu.CompilerParams(
            dimension_semantics=("parallel",),
            vmem_limit_bytes=32 * 1024 * 1024),
    )(xf, params["w1"], params["s1"], params["b1"],
      params["w2"], params["s2"], params["b2d"], params["alpha"])
    return out.reshape(n, cout, h, w)


# ---------------------------------------------------------------------------
# Parameter preparation (bias-only BN folding, tap-concatenated weights)
# ---------------------------------------------------------------------------
def fold_bn(gamma, beta, mean, var, eps=1e-5):
    scale = gamma / jnp.sqrt(var + eps)
    bias = beta - mean * scale
    return scale, bias


def build_params(raw):
    s1, b1 = fold_bn(*raw["bn1"])
    s2, b2 = fold_bn(*raw["bn2"])
    sd, bd = fold_bn(*raw["bnd"])
    cmid, cin = raw["w1"].shape[:2]
    cout = raw["w2"].shape[0]

    # conv1: torch (Cmid, Cin, ky, kx) -> (Cmid, ky, kx, Cin) -> (Cmid, 9*Cin)
    # Weights are UNSCALED bf16; the BN scale s1 is applied in f32 in-kernel.
    w1 = jnp.transpose(raw["w1"], (0, 2, 3, 1)).reshape(cmid, 9 * cin)

    # conv2: (Cout, 9*Cmid), then append the 1x1 downsample as a 10th "tap".
    # The downsample columns carry only the BN-scale RATIO sd/s2, so applying
    # the single f32 scale s2 to the merged accumulator reproduces sd on that
    # path; the bf16 error of wd*(sd/s2) equals the bf16 error of wd alone.
    w2 = jnp.transpose(raw["w2"], (0, 2, 3, 1)).reshape(cout, 9 * cmid)
    wd = raw["wd"][:, :, 0, 0] * (sd / s2)[:, None]
    w2cat = jnp.concatenate([w2, wd], axis=1)

    return {
        "w1": w1.astype(jnp.bfloat16),
        "s1": s1.reshape(cmid, 1).astype(jnp.float32),
        "b1": b1.reshape(cmid, 1).astype(jnp.float32),
        "w2": w2cat.astype(jnp.bfloat16),
        "s2": s2.reshape(cout, 1).astype(jnp.float32),
        "b2d": (b2 + bd).reshape(cout, 1).astype(jnp.float32),
        "alpha": jnp.asarray([raw["alpha"]], jnp.float32),
    }


# ---------------------------------------------------------------------------
# Pure-JAX reference (f32) for verification
# ---------------------------------------------------------------------------
def _conv_ref(x_nhwc, w_oihw, stride, pad):
    return jax.lax.conv_general_dilated(
        x_nhwc, jnp.transpose(w_oihw, (2, 3, 1, 0)),
        window_strides=(stride, stride), padding=[(pad, pad), (pad, pad)],
        dimension_numbers=("NHWC", "HWIO", "NHWC"))


def basic_block_ref(x_nchw, raw):
    x = jnp.transpose(x_nchw, (0, 2, 3, 1)).astype(jnp.float32)
    s1, b1 = fold_bn(*raw["bn1"])
    s2, b2 = fold_bn(*raw["bn2"])
    sd, bd = fold_bn(*raw["bnd"])
    y1 = jnp.maximum(_conv_ref(x, raw["w1"], 1, 1) * s1 + b1, 0.0)
    out = _conv_ref(y1, raw["w2"], 1, 1) * s2 + b2
    res = _conv_ref(x, raw["wd"], 1, 0) * sd + bd
    z = out + res
    z = jnp.where(z >= 0.0, z, raw["alpha"] * z)
    return jnp.transpose(z, (0, 3, 1, 2))


# ---------------------------------------------------------------------------
if __name__ == "__main__":
    # BasicBolock(len_list, stride=1) with len_list slice [Cin, Cmid, Cout]
    N, H, W = 2, 16, 16
    Cin, Cmid, Cout = 4, 8, 8            # len_list = [4, 8, 8], IND = 1

    key = jax.random.PRNGKey(0)
    ks = jax.random.split(key, 16)

    def bn_params(k, c):
        a, b, c_, d = jax.random.split(k, 4)
        gamma = 1.0 + 0.1 * jax.random.normal(a, (c,), jnp.float32)
        beta = 0.1 * jax.random.normal(b, (c,), jnp.float32)
        mean = 0.05 * jax.random.normal(c_, (c,), jnp.float32)
        var = 1.0 + 0.1 * jnp.abs(jax.random.normal(d, (c,), jnp.float32))
        return gamma, beta, mean, var

    raw = {
        "w1": 0.1 * jax.random.normal(ks[0], (Cmid, Cin, 3, 3), jnp.float32),
        "w2": 0.1 * jax.random.normal(ks[1], (Cout, Cmid, 3, 3), jnp.float32),
        "wd": 0.1 * jax.random.normal(ks[2], (Cout, Cin, 1, 1), jnp.float32),
        "bn1": bn_params(ks[3], Cmid),
        "bn2": bn_params(ks[4], Cout),
        "bnd": bn_params(ks[5], Cout),
        "alpha": jnp.float32(0.25),      # nn.PReLU default init
    }
    params = build_params(raw)

    x = jax.random.normal(ks[6], (N, Cin, H, W), jnp.float32)   # NCHW input

    out = jax.jit(basic_block_forward)(x, params)
    out = jax.block_until_ready(out)

    ref = basic_block_ref(x, raw)
    assert out.shape == (N, Cout, H, W), out.shape
    # bf16 MXU operands + bf16 output (f32 accumulation, f32 BN scales).
    err = jnp.max(jnp.abs(out.astype(jnp.float32) - ref))
    assert jnp.allclose(out.astype(jnp.float32), ref, rtol=5e-2, atol=5e-2), \
        float(err)

    print("KERNEL_OK")
</pallas_src>

<mosaic_0001>
module attributes {stable_mosaic.version = 11 : i64} {
  func.func @_basic_block_kernel(%arg0: i32, %arg1: memref<2x4x256xf32, #tpu.memory_space<vmem>>, %arg2: memref<8x36xbf16, #tpu.memory_space<vmem>>, %arg3: memref<8x1xf32, #tpu.memory_space<vmem>>, %arg4: memref<8x1xf32, #tpu.memory_space<vmem>>, %arg5: memref<8x76xbf16, #tpu.memory_space<vmem>>, %arg6: memref<8x1xf32, #tpu.memory_space<vmem>>, %arg7: memref<8x1xf32, #tpu.memory_space<vmem>>, %arg8: memref<1xf32, #tpu.memory_space<smem>>, %arg9: memref<2x8x256xbf16, #tpu.memory_space<vmem>>, %arg10: memref<4x1024xf32, #tpu.memory_space<vmem>>, %arg11: memref<36x768xf32, #tpu.memory_space<vmem>>, %arg12: memref<8x1024xf32, #tpu.memory_space<vmem>>, %arg13: memref<76x768xf32, #tpu.memory_space<vmem>>) attributes {dimension_semantics = [#tpu.dimension_semantics<parallel>], iteration_bounds = array<i64: 1>, scalar_prefetch = 0 : i64, scratch_operands = 4 : i64, tpu.core_type = #tpu.core_type<tc>, window_params = [{transform_indices = @transform_0, window_bounds = array<i64: 2, 4, 256>}, {pipeline_mode = #tpu.pipeline_mode<synchronous>, transform_indices = @transform_1, window_bounds = array<i64: 8, 36>}, {pipeline_mode = #tpu.pipeline_mode<synchronous>, transform_indices = @transform_2, window_bounds = array<i64: 8, 1>}, {pipeline_mode = #tpu.pipeline_mode<synchronous>, transform_indices = @transform_3, window_bounds = array<i64: 8, 1>}, {pipeline_mode = #tpu.pipeline_mode<synchronous>, transform_indices = @transform_4, window_bounds = array<i64: 8, 76>}, {pipeline_mode = #tpu.pipeline_mode<synchronous>, transform_indices = @transform_5, window_bounds = array<i64: 8, 1>}, {pipeline_mode = #tpu.pipeline_mode<synchronous>, transform_indices = @transform_6, window_bounds = array<i64: 8, 1>}, {transform_indices = @transform_7, window_bounds = array<i64: 1>}, {transform_indices = @transform_8, window_bounds = array<i64: 2, 8, 256>}]} {
    %0 = tpu.iota {dimensions = array<i32: 1>} : vector<1x768xi32>
    %c384_i32 = arith.constant 384 : i32
    %c0_i32 = arith.constant 0 : i32
    %1 = arith.cmpi eq, %c384_i32, %c0_i32 : i32
    %c1_i32 = arith.constant 1 : i32
    %2 = arith.select %1, %c1_i32, %c384_i32 : i32
    %3 = vector.broadcast %2 : i32 to vector<1x768xi32>
    %4 = arith.remsi %0, %3 : vector<1x768xi32>
    %c0_i32_0 = arith.constant 0 : i32
    %5 = vector.broadcast %c0_i32_0 : i32 to vector<1x768xi32>
    %6 = arith.cmpi ne, %4, %5 : vector<1x768xi32>
    %c0_i32_1 = arith.constant 0 : i32
    %7 = vector.broadcast %c0_i32_1 : i32 to vector<1x768xi32>
    %8 = arith.cmpi slt, %4, %7 : vector<1x768xi32>
    %c0_i32_2 = arith.constant 0 : i32
    %9 = arith.cmpi slt, %2, %c0_i32_2 : i32
    %10 = vector.broadcast %9 : i1 to vector<1x768xi1>
    %11 = vector.broadcast %10 : vector<1x768xi1> to vector<1x768xi1>
    %12 = arith.xori %8, %11 : vector<1x768xi1>
    %13 = arith.andi %12, %6 : vector<1x768xi1>
    %14 = vector.broadcast %2 : i32 to vector<1x768xi32>
    %15 = arith.addi %4, %14 : vector<1x768xi32>
    %16 = arith.select %13, %15, %4 : vector<1x768xi1>, vector<1x768xi32>
    %c16_i32 = arith.constant 16 : i32
    %c0_i32_3 = arith.constant 0 : i32
    %17 = arith.cmpi eq, %c16_i32, %c0_i32_3 : i32
    %c1_i32_4 = arith.constant 1 : i32
    %18 = arith.select %17, %c1_i32_4, %c16_i32 : i32
    %19 = vector.broadcast %18 : i32 to vector<1x768xi32>
    %20 = arith.remsi %16, %19 : vector<1x768xi32>
    %c0_i32_5 = arith.constant 0 : i32
    %21 = vector.broadcast %c0_i32_5 : i32 to vector<1x768xi32>
    %22 = arith.cmpi ne, %20, %21 : vector<1x768xi32>
    %c0_i32_6 = arith.constant 0 : i32
    %23 = vector.broadcast %c0_i32_6 : i32 to vector<1x768xi32>
    %24 = arith.cmpi slt, %20, %23 : vector<1x768xi32>
    %c0_i32_7 = arith.constant 0 : i32
    %25 = arith.cmpi slt, %18, %c0_i32_7 : i32
    %26 = vector.broadcast %25 : i1 to vector<1x768xi1>
    %27 = vector.broadcast %26 : vector<1x768xi1> to vector<1x768xi1>
    %28 = arith.xori %24, %27 : vector<1x768xi1>
    %29 = arith.andi %28, %22 : vector<1x768xi1>
    %30 = vector.broadcast %18 : i32 to vector<1x768xi32>
    %31 = arith.addi %20, %30 : vector<1x768xi32>
    %32 = arith.select %29, %31, %20 : vector<1x768xi1>, vector<1x768xi32>
    %c1_i32_8 = arith.constant 1 : i32
    %33 = vector.broadcast %c1_i32_8 : i32 to vector<1x768xi32>
    %34 = arith.cmpi sge, %32, %33 : vector<1x768xi32>
    %c14_i32 = arith.constant 14 : i32
    %35 = vector.broadcast %c14_i32 : i32 to vector<1x768xi32>
    %36 = arith.cmpi sle, %32, %35 : vector<1x768xi32>
    %cst = arith.constant 0.000000e+00 : f32
    %37 = vector.broadcast %cst : f32 to vector<4x128xf32>
    %c0 = arith.constant 0 : index
    %c0_9 = arith.constant 0 : index
    %38 = vector.load %arg10[%c0, %c0_9] : memref<4x1024xf32, #tpu.memory_space<vmem>>, vector<4x128xf32>
    tpu.vector_store %arg10[%c0, %c0_9], %37 {strides = array<i32>} : memref<4x1024xf32, #tpu.memory_space<vmem>>, vector<4x128xf32>,
    %cst_10 = arith.constant 0.000000e+00 : f32
    %39 = vector.broadcast %cst_10 : f32 to vector<4x128xf32>
    %c0_11 = arith.constant 0 : index
    %c896 = arith.constant 896 : index
    %40 = vector.load %arg10[%c0_11, %c896] : memref<4x1024xf32, #tpu.memory_space<vmem>>, vector<4x128xf32>
    tpu.vector_store %arg10[%c0_11, %c896], %39 {strides = array<i32>} : memref<4x1024xf32, #tpu.memory_space<vmem>>, vector<4x128xf32>,
    %cst_12 = arith.constant 0.000000e+00 : f32
    %41 = vector.broadcast %cst_12 : f32 to vector<4x128xf32>
    %c0_13 = arith.constant 0 : index
    %c384 = arith.constant 384 : index
    %42 = vector.load %arg10[%c0_13, %c384] : memref<4x1024xf32, #tpu.memory_space<vmem>>, vector<4x128xf32>
    tpu.vector_store %arg10[%c0_13, %c384], %41 {strides = array<i32>} : memref<4x1024xf32, #tpu.memory_space<vmem>>, vector<4x128xf32>,
    %cst_14 = arith.constant 0.000000e+00 : f32
    %43 = vector.broadcast %cst_14 : f32 to vector<4x128xf32>
    %c0_15 = arith.constant 0 : index
    %c768 = arith.constant 768 : index
    %44 = vector.load %arg10[%c0_15, %c768] : memref<4x1024xf32, #tpu.memory_space<vmem>>, vector<4x128xf32>
    tpu.vector_store %arg10[%c0_15, %c768], %43 {strides = array<i32>} : memref<4x1024xf32, #tpu.memory_space<vmem>>, vector<4x128xf32>,
    %cst_16 = arith.constant 0.000000e+00 : f32
    %45 = vector.broadcast %cst_16 : f32 to vector<8x128xf32>
    %c0_17 = arith.constant 0 : index
    %c0_18 = arith.constant 0 : index
    %46 = vector.load %arg12[%c0_17, %c0_18] : memref<8x1024xf32, #tpu.memory_space<vmem>>, vector<8x128xf32>
    tpu.vector_store %arg12[%c0_17, %c0_18], %45 {strides = array<i32>} : memref<8x1024xf32, #tpu.memory_space<vmem>>, vector<8x128xf32>,
    %cst_19 = arith.constant 0.000000e+00 : f32
    %47 = vector.broadcast %cst_19 : f32 to vector<8x128xf32>
    %c0_20 = arith.constant 0 : index
    %c896_21 = arith.constant 896 : index
    %48 = vector.load %arg12[%c0_20, %c896_21] : memref<8x1024xf32, #tpu.memory_space<vmem>>, vector<8x128xf32>
    tpu.vector_store %arg12[%c0_20, %c896_21], %47 {strides = array<i32>} : memref<8x1024xf32, #tpu.memory_space<vmem>>, vector<8x128xf32>,
    %cst_22 = arith.constant 0.000000e+00 : f32
    %49 = vector.broadcast %cst_22 : f32 to vector<8x128xf32>
    %c0_23 = arith.constant 0 : index
    %c384_24 = arith.constant 384 : index
    %50 = vector.load %arg12[%c0_23, %c384_24] : memref<8x1024xf32, #tpu.memory_space<vmem>>, vector<8x128xf32>
    tpu.vector_store %arg12[%c0_23, %c384_24], %49 {strides = array<i32>} : memref<8x1024xf32, #tpu.memory_space<vmem>>, vector<8x128xf32>,
    %cst_25 = arith.constant 0.000000e+00 : f32
    %51 = vector.broadcast %cst_25 : f32 to vector<8x128xf32>
    %c0_26 = arith.constant 0 : index
    %c768_27 = arith.constant 768 : index
    %52 = vector.load %arg12[%c0_26, %c768_27] : memref<8x1024xf32, #tpu.memory_space<vmem>>, vector<8x128xf32>
    tpu.vector_store %arg12[%c0_26, %c768_27], %51 {strides = array<i32>} : memref<8x1024xf32, #tpu.memory_space<vmem>>, vector<8x128xf32>,
    %c0_28 = arith.constant 0 : index
    %c0_29 = arith.constant 0 : index
    %c0_30 = arith.constant 0 : index
    %53 = vector.load %arg1[%c0_28, %c0_29, %c0_30] : memref<2x4x256xf32, #tpu.memory_space<vmem>>, vector<1x4x256xf32>
    %54 = vector.shape_cast %53 : vector<1x4x256xf32> to vector<4x256xf32>
    %c0_31 = arith.constant 0 : index
    %c128 = arith.constant 128 : index
    %55 = vector.load %arg10[%c0_31, %c128] : memref<4x1024xf32, #tpu.memory_space<vmem>>, vector<4x256xf32>
    tpu.vector_store %arg10[%c0_31, %c128], %54 {strides = array<i32>} : memref<4x1024xf32, #tpu.memory_space<vmem>>, vector<4x256xf32>,
    %c1 = arith.constant 1 : index
    %c0_32 = arith.constant 0 : index
    %c0_33 = arith.constant 0 : index
    %56 = vector.load %arg1[%c1, %c0_32, %c0_33] : memref<2x4x256xf32, #tpu.memory_space<vmem>>, vector<1x4x256xf32>
    %57 = vector.shape_cast %56 : vector<1x4x256xf32> to vector<4x256xf32>
    %c0_34 = arith.constant 0 : index
    %c512 = arith.constant 512 : index
    %58 = vector.load %arg10[%c0_34, %c512] : memref<4x1024xf32, #tpu.memory_space<vmem>>, vector<4x256xf32>
    tpu.vector_store %arg10[%c0_34, %c512], %57 {strides = array<i32>} : memref<4x1024xf32, #tpu.memory_space<vmem>>, vector<4x256xf32>,
    %c0_35 = arith.constant 0 : index
    %c111 = arith.constant 111 : index
    %59 = vector.load %arg10[%c0_35, %c111] : memref<4x1024xf32, #tpu.memory_space<vmem>>, vector<4x768xf32>
    %cst_36 = arith.constant 0.000000e+00 : f32
    %60 = vector.shape_cast %34 : vector<1x768xi1> to vector<1x768xi1>
    %61 = vector.broadcast %60 : vector<1x768xi1> to vector<4x768xi1>
    %62 = vector.broadcast %cst_36 : f32 to vector<4x768xf32>
    %63 = arith.select %61, %59, %62 : vector<4x768xi1>, vector<4x768xf32>
    %c0_37 = arith.constant 0 : index
    %c0_38 = arith.constant 0 : index
    %64 = vector.load %arg11[%c0_37, %c0_38] : memref<36x768xf32, #tpu.memory_space<vmem>>, vector<4x768xf32>
    tpu.vector_store %arg11[%c0_37, %c0_38], %63 {strides = array<i32>} : memref<36x768xf32, #tpu.memory_space<vmem>>, vector<4x768xf32>,
    %c0_39 = arith.constant 0 : index
    %c112 = arith.constant 112 : index
    %65 = vector.load %arg10[%c0_39, %c112] : memref<4x1024xf32, #tpu.memory_space<vmem>>, vector<4x768xf32>
    %c4 = arith.constant 4 : index
    %c0_40 = arith.constant 0 : index
    %66 = vector.load %arg11[%c4, %c0_40] : memref<36x768xf32, #tpu.memory_space<vmem>>, vector<4x768xf32>
    tpu.vector_store %arg11[%c4, %c0_40], %65 {strides = array<i32>} : memref<36x768xf32, #tpu.memory_space<vmem>>, vector<4x768xf32>,
    %c0_41 = arith.constant 0 : index
    %c113 = arith.constant 113 : index
    %67 = vector.load %arg10[%c0_41, %c113] : memref<4x1024xf32, #tpu.memory_space<vmem>>, vector<4x768xf32>
    %cst_42 = arith.constant 0.000000e+00 : f32
    %68 = vector.shape_cast %36 : vector<1x768xi1> to vector<1x768xi1>
    %69 = vector.broadcast %68 : vector<1x768xi1> to vector<4x768xi1>
    %70 = vector.broadcast %cst_42 : f32 to vector<4x768xf32>
    %71 = arith.select %69, %67, %70 : vector<4x768xi1>, vector<4x768xf32>
    %c8 = arith.constant 8 : index
    %c0_43 = arith.constant 0 : index
    %72 = vector.load %arg11[%c8, %c0_43] : memref<36x768xf32, #tpu.memory_space<vmem>>, vector<4x768xf32>
    tpu.vector_store %arg11[%c8, %c0_43], %71 {strides = array<i32>} : memref<36x768xf32, #tpu.memory_space<vmem>>, vector<4x768xf32>,
    %c0_44 = arith.constant 0 : index
    %c127 = arith.constant 127 : index
    %73 = vector.load %arg10[%c0_44, %c127] : memref<4x1024xf32, #tpu.memory_space<vmem>>, vector<4x768xf32>
    %cst_45 = arith.constant 0.000000e+00 : f32
    %74 = vector.shape_cast %34 : vector<1x768xi1> to vector<1x768xi1>
    %75 = vector.broadcast %74 : vector<1x768xi1> to vector<4x768xi1>
    %76 = vector.broadcast %cst_45 : f32 to vector<4x768xf32>
    %77 = arith.select %75, %73, %76 : vector<4x768xi1>, vector<4x768xf32>
    %c12 = arith.constant 12 : index
    %c0_46 = arith.constant 0 : index
    %78 = vector.load %arg11[%c12, %c0_46] : memref<36x768xf32, #tpu.memory_space<vmem>>, vector<4x768xf32>
    tpu.vector_store %arg11[%c12, %c0_46], %77 {strides = array<i32>} : memref<36x768xf32, #tpu.memory_space<vmem>>, vector<4x768xf32>,
    %c0_47 = arith.constant 0 : index
    %c128_48 = arith.constant 128 : index
    %79 = vector.load %arg10[%c0_47, %c128_48] : memref<4x1024xf32, #tpu.memory_space<vmem>>, vector<4x768xf32>
    %c16 = arith.constant 16 : index
    %c0_49 = arith.constant 0 : index
    %80 = vector.load %arg11[%c16, %c0_49] : memref<36x768xf32, #tpu.memory_space<vmem>>, vector<4x768xf32>
    tpu.vector_store %arg11[%c16, %c0_49], %79 {strides = array<i32>} : memref<36x768xf32, #tpu.memory_space<vmem>>, vector<4x768xf32>,
    %c0_50 = arith.constant 0 : index
    %c129 = arith.constant 129 : index
    %81 = vector.load %arg10[%c0_50, %c129] : memref<4x1024xf32, #tpu.memory_space<vmem>>, vector<4x768xf32>
    %cst_51 = arith.constant 0.000000e+00 : f32
    %82 = vector.shape_cast %36 : vector<1x768xi1> to vector<1x768xi1>
    %83 = vector.broadcast %82 : vector<1x768xi1> to vector<4x768xi1>
    %84 = vector.broadcast %cst_51 : f32 to vector<4x768xf32>
    %85 = arith.select %83, %81, %84 : vector<4x768xi1>, vector<4x768xf32>
    %c20 = arith.constant 20 : index
    %c0_52 = arith.constant 0 : index
    %86 = vector.load %arg11[%c20, %c0_52] : memref<36x768xf32, #tpu.memory_space<vmem>>, vector<4x768xf32>
    tpu.vector_store %arg11[%c20, %c0_52], %85 {strides = array<i32>} : memref<36x768xf32, #tpu.memory_space<vmem>>, vector<4x768xf32>,
    %c0_53 = arith.constant 0 : index
    %c143 = arith.constant 143 : index
    %87 = vector.load %arg10[%c0_53, %c143] : memref<4x1024xf32, #tpu.memory_space<vmem>>, vector<4x768xf32>
    %cst_54 = arith.constant 0.000000e+00 : f32
    %88 = vector.shape_cast %34 : vector<1x768xi1> to vector<1x768xi1>
    %89 = vector.broadcast %88 : vector<1x768xi1> to vector<4x768xi1>
    %90 = vector.broadcast %cst_54 : f32 to vector<4x768xf32>
    %91 = arith.select %89, %87, %90 : vector<4x768xi1>, vector<4x768xf32>
    %c24 = arith.constant 24 : index
    %c0_55 = arith.constant 0 : index
    %92 = vector.load %arg11[%c24, %c0_55] : memref<36x768xf32, #tpu.memory_space<vmem>>, vector<4x768xf32>
    tpu.vector_store %arg11[%c24, %c0_55], %91 {strides = array<i32>} : memref<36x768xf32, #tpu.memory_space<vmem>>, vector<4x768xf32>,
    %c0_56 = arith.constant 0 : index
    %c144 = arith.constant 144 : index
    %93 = vector.load %arg10[%c0_56, %c144] : memref<4x1024xf32, #tpu.memory_space<vmem>>, vector<4x768xf32>
    %c28 = arith.constant 28 : index
    %c0_57 = arith.constant 0 : index
    %94 = vector.load %arg11[%c28, %c0_57] : memref<36x768xf32, #tpu.memory_space<vmem>>, vector<4x768xf32>
    tpu.vector_store %arg11[%c28, %c0_57], %93 {strides = array<i32>} : memref<36x768xf32, #tpu.memory_space<vmem>>, vector<4x768xf32>,
    %c0_58 = arith.constant 0 : index
    %c145 = arith.constant 145 : index
    %95 = vector.load %arg10[%c0_58, %c145] : memref<4x1024xf32, #tpu.memory_space<vmem>>, vector<4x768xf32>
    %cst_59 = arith.constant 0.000000e+00 : f32
    %96 = vector.shape_cast %36 : vector<1x768xi1> to vector<1x768xi1>
    %97 = vector.broadcast %96 : vector<1x768xi1> to vector<4x768xi1>
    %98 = vector.broadcast %cst_59 : f32 to vector<4x768xf32>
    %99 = arith.select %97, %95, %98 : vector<4x768xi1>, vector<4x768xf32>
    %c32 = arith.constant 32 : index
    %c0_60 = arith.constant 0 : index
    %100 = vector.load %arg11[%c32, %c0_60] : memref<36x768xf32, #tpu.memory_space<vmem>>, vector<4x768xf32>
    tpu.vector_store %arg11[%c32, %c0_60], %99 {strides = array<i32>} : memref<36x768xf32, #tpu.memory_space<vmem>>, vector<4x768xf32>,
    %c0_61 = arith.constant 0 : index
    %c0_62 = arith.constant 0 : index
    %101 = vector.load %arg2[%c0_61, %c0_62] : memref<8x36xbf16, #tpu.memory_space<vmem>>, vector<8x36xbf16>
    %c0_63 = arith.constant 0 : index
    %c0_64 = arith.constant 0 : index
    %102 = vector.load %arg11[%c0_63, %c0_64] : memref<36x768xf32, #tpu.memory_space<vmem>>, vector<36x768xf32>
    %103 = arith.truncf %102 : vector<36x768xf32> to vector<36x768xbf16>
    %cst_65 = arith.constant dense<0.000000e+00> : vector<8x768xf32>
    %104 = tpu.matmul %101, %103, %cst_65 {dimension_numbers = #tpu.dot_dimension_numbers<[1], [0], [0], [1], [0, 0, 1, 1], [], []>} : vector<8x36xbf16>, vector<36x768xbf16>, vector<8x768xf32> -> vector<8x768xf32>
    %c0_66 = arith.constant 0 : index
    %c0_67 = arith.constant 0 : index
    %105 = vector.load %arg3[%c0_66, %c0_67] : memref<8x1xf32, #tpu.memory_space<vmem>>, vector<8x1xf32>
    %106 = vector.broadcast %105 : vector<8x1xf32> to vector<8x768xf32>
    %107 = arith.mulf %104, %106 : vector<8x768xf32>
    %c0_68 = arith.constant 0 : index
    %c0_69 = arith.constant 0 : index
    %108 = vector.load %arg4[%c0_68, %c0_69] : memref<8x1xf32, #tpu.memory_space<vmem>>, vector<8x1xf32>
    %109 = vector.broadcast %108 : vector<8x1xf32> to vector<8x768xf32>
    %110 = arith.addf %107, %109 : vector<8x768xf32>
    %cst_70 = arith.constant 0.000000e+00 : f32
    %111 = vector.broadcast %cst_70 : f32 to vector<8x768xf32>
    %112 = arith.maximumf %110, %111 : vector<8x768xf32>
    %113 = vector.extract_strided_slice %112 {offsets = [0, 0], sizes = [8, 256], strides = [1, 1]} : vector<8x768xf32> to vector<8x256xf32>
    %c0_71 = arith.constant 0 : index
    %c128_72 = arith.constant 128 : index
    %114 = vector.load %arg12[%c0_71, %c128_72] : memref<8x1024xf32, #tpu.memory_space<vmem>>, vector<8x256xf32>
    tpu.vector_store %arg12[%c0_71, %c128_72], %113 {strides = array<i32>} : memref<8x1024xf32, #tpu.memory_space<vmem>>, vector<8x256xf32>,
    %115 = vector.extract_strided_slice %112 {offsets = [0, 384], sizes = [8, 256], strides = [1, 1]} : vector<8x768xf32> to vector<8x256xf32>
    %c0_73 = arith.constant 0 : index
    %c512_74 = arith.constant 512 : index
    %116 = vector.load %arg12[%c0_73, %c512_74] : memref<8x1024xf32, #tpu.memory_space<vmem>>, vector<8x256xf32>
    tpu.vector_store %arg12[%c0_73, %c512_74], %115 {strides = array<i32>} : memref<8x1024xf32, #tpu.memory_space<vmem>>, vector<8x256xf32>,
    %c0_75 = arith.constant 0 : index
    %c111_76 = arith.constant 111 : index
    %117 = vector.load %arg12[%c0_75, %c111_76] : memref<8x1024xf32, #tpu.memory_space<vmem>>, vector<8x768xf32>
    %cst_77 = arith.constant 0.000000e+00 : f32
    %118 = vector.shape_cast %34 : vector<1x768xi1> to vector<1x768xi1>
    %119 = vector.broadcast %118 : vector<1x768xi1> to vector<8x768xi1>
    %120 = vector.broadcast %cst_77 : f32 to vector<8x768xf32>
    %121 = arith.select %119, %117, %120 : vector<8x768xi1>, vector<8x768xf32>
    %c0_78 = arith.constant 0 : index
    %c0_79 = arith.constant 0 : index
    %122 = vector.load %arg13[%c0_78, %c0_79] : memref<76x768xf32, #tpu.memory_space<vmem>>, vector<8x768xf32>
    tpu.vector_store %arg13[%c0_78, %c0_79], %121 {strides = array<i32>} : memref<76x768xf32, #tpu.memory_space<vmem>>, vector<8x768xf32>,
    %c0_80 = arith.constant 0 : index
    %c112_81 = arith.constant 112 : index
    %123 = vector.load %arg12[%c0_80, %c112_81] : memref<8x1024xf32, #tpu.memory_space<vmem>>, vector<8x768xf32>
    %c8_82 = arith.constant 8 : index
    %c0_83 = arith.constant 0 : index
    %124 = vector.load %arg13[%c8_82, %c0_83] : memref<76x768xf32, #tpu.memory_space<vmem>>, vector<8x768xf32>
    tpu.vector_store %arg13[%c8_82, %c0_83], %123 {strides = array<i32>} : memref<76x768xf32, #tpu.memory_space<vmem>>, vector<8x768xf32>,
    %c0_84 = arith.constant 0 : index
    %c113_85 = arith.constant 113 : index
    %125 = vector.load %arg12[%c0_84, %c113_85] : memref<8x1024xf32, #tpu.memory_space<vmem>>, vector<8x768xf32>
    %cst_86 = arith.constant 0.000000e+00 : f32
    %126 = vector.shape_cast %36 : vector<1x768xi1> to vector<1x768xi1>
    %127 = vector.broadcast %126 : vector<1x768xi1> to vector<8x768xi1>
    %128 = vector.broadcast %cst_86 : f32 to vector<8x768xf32>
    %129 = arith.select %127, %125, %128 : vector<8x768xi1>, vector<8x768xf32>
    %c16_87 = arith.constant 16 : index
    %c0_88 = arith.constant 0 : index
    %130 = vector.load %arg13[%c16_87, %c0_88] : memref<76x768xf32, #tpu.memory_space<vmem>>, vector<8x768xf32>
    tpu.vector_store %arg13[%c16_87, %c0_88], %129 {strides = array<i32>} : memref<76x768xf32, #tpu.memory_space<vmem>>, vector<8x768xf32>,
    %c0_89 = arith.constant 0 : index
    %c127_90 = arith.constant 127 : index
    %131 = vector.load %arg12[%c0_89, %c127_90] : memref<8x1024xf32, #tpu.memory_space<vmem>>, vector<8x768xf32>
    %cst_91 = arith.constant 0.000000e+00 : f32
    %132 = vector.shape_cast %34 : vector<1x768xi1> to vector<1x768xi1>
    %133 = vector.broadcast %132 : vector<1x768xi1> to vector<8x768xi1>
    %134 = vector.broadcast %cst_91 : f32 to vector<8x768xf32>
    %135 = arith.select %133, %131, %134 : vector<8x768xi1>, vector<8x768xf32>
    %c24_92 = arith.constant 24 : index
    %c0_93 = arith.constant 0 : index
    %136 = vector.load %arg13[%c24_92, %c0_93] : memref<76x768xf32, #tpu.memory_space<vmem>>, vector<8x768xf32>
    tpu.vector_store %arg13[%c24_92, %c0_93], %135 {strides = array<i32>} : memref<76x768xf32, #tpu.memory_space<vmem>>, vector<8x768xf32>,
    %c0_94 = arith.constant 0 : index
    %c128_95 = arith.constant 128 : index
    %137 = vector.load %arg12[%c0_94, %c128_95] : memref<8x1024xf32, #tpu.memory_space<vmem>>, vector<8x768xf32>
    %c32_96 = arith.constant 32 : index
    %c0_97 = arith.constant 0 : index
    %138 = vector.load %arg13[%c32_96, %c0_97] : memref<76x768xf32, #tpu.memory_space<vmem>>, vector<8x768xf32>
    tpu.vector_store %arg13[%c32_96, %c0_97], %137 {strides = array<i32>} : memref<76x768xf32, #tpu.memory_space<vmem>>, vector<8x768xf32>,
    %c0_98 = arith.constant 0 : index
    %c129_99 = arith.constant 129 : index
    %139 = vector.load %arg12[%c0_98, %c129_99] : memref<8x1024xf32, #tpu.memory_space<vmem>>, vector<8x768xf32>
    %cst_100 = arith.constant 0.000000e+00 : f32
    %140 = vector.shape_cast %36 : vector<1x768xi1> to vector<1x768xi1>
    %141 = vector.broadcast %140 : vector<1x768xi1> to vector<8x768xi1>
    %142 = vector.broadcast %cst_100 : f32 to vector<8x768xf32>
    %143 = arith.select %141, %139, %142 : vector<8x768xi1>, vector<8x768xf32>
    %c40 = arith.constant 40 : index
    %c0_101 = arith.constant 0 : index
    %144 = vector.load %arg13[%c40, %c0_101] : memref<76x768xf32, #tpu.memory_space<vmem>>, vector<8x768xf32>
    tpu.vector_store %arg13[%c40, %c0_101], %143 {strides = array<i32>} : memref<76x768xf32, #tpu.memory_space<vmem>>, vector<8x768xf32>,
    %c0_102 = arith.constant 0 : index
    %c143_103 = arith.constant 143 : index
    %145 = vector.load %arg12[%c0_102, %c143_103] : memref<8x1024xf32, #tpu.memory_space<vmem>>, vector<8x768xf32>
    %cst_104 = arith.constant 0.000000e+00 : f32
    %146 = vector.shape_cast %34 : vector<1x768xi1> to vector<1x768xi1>
    %147 = vector.broadcast %146 : vector<1x768xi1> to vector<8x768xi1>
    %148 = vector.broadcast %cst_104 : f32 to vector<8x768xf32>
    %149 = arith.select %147, %145, %148 : vector<8x768xi1>, vector<8x768xf32>
    %c48 = arith.constant 48 : index
    %c0_105 = arith.constant 0 : index
    %150 = vector.load %arg13[%c48, %c0_105] : memref<76x768xf32, #tpu.memory_space<vmem>>, vector<8x768xf32>
    tpu.vector_store %arg13[%c48, %c0_105], %149 {strides = array<i32>} : memref<76x768xf32, #tpu.memory_space<vmem>>, vector<8x768xf32>,
    %c0_106 = arith.constant 0 : index
    %c144_107 = arith.constant 144 : index
    %151 = vector.load %arg12[%c0_106, %c144_107] : memref<8x1024xf32, #tpu.memory_space<vmem>>, vector<8x768xf32>
    %c56 = arith.constant 56 : index
    %c0_108 = arith.constant 0 : index
    %152 = vector.load %arg13[%c56, %c0_108] : memref<76x768xf32, #tpu.memory_space<vmem>>, vector<8x768xf32>
    tpu.vector_store %arg13[%c56, %c0_108], %151 {strides = array<i32>} : memref<76x768xf32, #tpu.memory_space<vmem>>, vector<8x768xf32>,
    %c0_109 = arith.constant 0 : index
    %c145_110 = arith.constant 145 : index
    %153 = vector.load %arg12[%c0_109, %c145_110] : memref<8x1024xf32, #tpu.memory_space<vmem>>, vector<8x768xf32>
    %cst_111 = arith.constant 0.000000e+00 : f32
    %154 = vector.shape_cast %36 : vector<1x768xi1> to vector<1x768xi1>
    %155 = vector.broadcast %154 : vector<1x768xi1> to vector<8x768xi1>
    %156 = vector.broadcast %cst_111 : f32 to vector<8x768xf32>
    %157 = arith.select %155, %153, %156 : vector<8x768xi1>, vector<8x768xf32>
    %c64 = arith.constant 64 : index
    %c0_112 = arith.constant 0 : index
    %158 = vector.load %arg13[%c64, %c0_112] : memref<76x768xf32, #tpu.memory_space<vmem>>, vector<8x768xf32>
    tpu.vector_store %arg13[%c64, %c0_112], %157 {strides = array<i32>} : memref<76x768xf32, #tpu.memory_space<vmem>>, vector<8x768xf32>,
    %c0_113 = arith.constant 0 : index
    %c128_114 = arith.constant 128 : index
    %159 = vector.load %arg10[%c0_113, %c128_114] : memref<4x1024xf32, #tpu.memory_space<vmem>>, vector<4x768xf32>
    %c72 = arith.constant 72 : index
    %c0_115 = arith.constant 0 : index
    %160 = vector.load %arg13[%c72, %c0_115] : memref<76x768xf32, #tpu.memory_space<vmem>>, vector<4x768xf32>
    tpu.vector_store %arg13[%c72, %c0_115], %159 {strides = array<i32>} : memref<76x768xf32, #tpu.memory_space<vmem>>, vector<4x768xf32>,
    %c0_116 = arith.constant 0 : index
    %c0_117 = arith.constant 0 : index
    %161 = vector.load %arg5[%c0_116, %c0_117] : memref<8x76xbf16, #tpu.memory_space<vmem>>, vector<8x76xbf16>
    %c0_118 = arith.constant 0 : index
    %c0_119 = arith.constant 0 : index
    %162 = vector.load %arg13[%c0_118, %c0_119] : memref<76x768xf32, #tpu.memory_space<vmem>>, vector<76x768xf32>
    %163 = arith.truncf %162 : vector<76x768xf32> to vector<76x768xbf16>
    %cst_120 = arith.constant dense<0.000000e+00> : vector<8x768xf32>
    %164 = tpu.matmul %161, %163, %cst_120 {dimension_numbers = #tpu.dot_dimension_numbers<[1], [0], [0], [1], [0, 0, 1, 1], [], []>} : vector<8x76xbf16>, vector<76x768xbf16>, vector<8x768xf32> -> vector<8x768xf32>
    %c0_121 = arith.constant 0 : index
    %c0_122 = arith.constant 0 : index
    %165 = vector.load %arg6[%c0_121, %c0_122] : memref<8x1xf32, #tpu.memory_space<vmem>>, vector<8x1xf32>
    %166 = vector.broadcast %165 : vector<8x1xf32> to vector<8x768xf32>
    %167 = arith.mulf %164, %166 : vector<8x768xf32>
    %c0_123 = arith.constant 0 : index
    %c0_124 = arith.constant 0 : index
    %168 = vector.load %arg7[%c0_123, %c0_124] : memref<8x1xf32, #tpu.memory_space<vmem>>, vector<8x1xf32>
    %169 = vector.broadcast %168 : vector<8x1xf32> to vector<8x768xf32>
    %170 = arith.addf %167, %169 : vector<8x768xf32>
    %c0_125 = arith.constant 0 : index
    %171 = memref.load %arg8[%c0_125] : memref<1xf32, #tpu.memory_space<smem>>
    %cst_126 = arith.constant 0.000000e+00 : f32
    %172 = vector.broadcast %cst_126 : f32 to vector<8x768xf32>
    %173 = arith.cmpf oge, %170, %172 : vector<8x768xf32>
    %174 = vector.broadcast %171 : f32 to vector<8x768xf32>
    %175 = arith.mulf %174, %170 : vector<8x768xf32>
    %176 = arith.select %173, %170, %175 : vector<8x768xi1>, vector<8x768xf32>
    %177 = vector.extract_strided_slice %176 {offsets = [0, 0], sizes = [8, 256], strides = [1, 1]} : vector<8x768xf32> to vector<8x256xf32>
    %178 = arith.truncf %177 : vector<8x256xf32> to vector<8x256xbf16>
    %c0_127 = arith.constant 0 : index
    %c0_128 = arith.constant 0 : index
    %c0_129 = arith.constant 0 : index
    %179 = vector.load %arg9[%c0_127, %c0_128, %c0_129] : memref<2x8x256xbf16, #tpu.memory_space<vmem>>, vector<1x8x256xbf16>
    %180 = vector.shape_cast %179 : vector<1x8x256xbf16> to vector<8x256xbf16>
    %181 = vector.shape_cast %178 : vector<8x256xbf16> to vector<1x8x256xbf16>
    tpu.vector_store %arg9[%c0_127, %c0_128, %c0_129], %181 {strides = array<i32>} : memref<2x8x256xbf16, #tpu.memory_space<vmem>>, vector<1x8x256xbf16>,
    %182 = vector.extract_strided_slice %176 {offsets = [0, 384], sizes = [8, 256], strides = [1, 1]} : vector<8x768xf32> to vector<8x256xf32>
    %183 = arith.truncf %182 : vector<8x256xf32> to vector<8x256xbf16>
    %c1_130 = arith.constant 1 : index
    %c0_131 = arith.constant 0 : index
    %c0_132 = arith.constant 0 : index
    %184 = vector.load %arg9[%c1_130, %c0_131, %c0_132] : memref<2x8x256xbf16, #tpu.memory_space<vmem>>, vector<1x8x256xbf16>
    %185 = vector.shape_cast %184 : vector<1x8x256xbf16> to vector<8x256xbf16>
    %186 = vector.shape_cast %183 : vector<8x256xbf16> to vector<1x8x256xbf16>
    tpu.vector_store %arg9[%c1_130, %c0_131, %c0_132], %186 {strides = array<i32>} : memref<2x8x256xbf16, #tpu.memory_space<vmem>>, vector<1x8x256xbf16>,
    return
  }
  func.func @transform_0(%arg0: i32) -> (i32, i32, i32) {
    %c0_i32 = arith.constant 0 : i32
    %c0_i32_0 = arith.constant 0 : i32
    %c0_i32_1 = arith.constant 0 : i32
    return %arg0, %c0_i32, %c0_i32_0 : i32, i32, i32
  }
  func.func @transform_1(%arg0: i32) -> (i32, i32) {
    %c0_i32 = arith.constant 0 : i32
    %c0_i32_0 = arith.constant 0 : i32
    %c0_i32_1 = arith.constant 0 : i32
    return %c0_i32, %c0_i32_0 : i32, i32
  }
  func.func @transform_2(%arg0: i32) -> (i32, i32) {
    %c0_i32 = arith.constant 0 : i32
    %c0_i32_0 = arith.constant 0 : i32
    %c0_i32_1 = arith.constant 0 : i32
    return %c0_i32, %c0_i32_0 : i32, i32
  }
  func.func @transform_3(%arg0: i32) -> (i32, i32) {
    %c0_i32 = arith.constant 0 : i32
    %c0_i32_0 = arith.constant 0 : i32
    %c0_i32_1 = arith.constant 0 : i32
    return %c0_i32, %c0_i32_0 : i32, i32
  }
  func.func @transform_4(%arg0: i32) -> (i32, i32) {
    %c0_i32 = arith.constant 0 : i32
    %c0_i32_0 = arith.constant 0 : i32
    %c0_i32_1 = arith.constant 0 : i32
    return %c0_i32, %c0_i32_0 : i32, i32
  }
  func.func @transform_5(%arg0: i32) -> (i32, i32) {
    %c0_i32 = arith.constant 0 : i32
    %c0_i32_0 = arith.constant 0 : i32
    %c0_i32_1 = arith.constant 0 : i32
    return %c0_i32, %c0_i32_0 : i32, i32
  }
  func.func @transform_6(%arg0: i32) -> (i32, i32) {
    %c0_i32 = arith.constant 0 : i32
    %c0_i32_0 = arith.constant 0 : i32
    %c0_i32_1 = arith.constant 0 : i32
    return %c0_i32, %c0_i32_0 : i32, i32
  }
  func.func @transform_7(%arg0: i32) -> i32 {
    %c0_i32 = arith.constant 0 : i32
    %c0_i32_0 = arith.constant 0 : i32
    return %c0_i32 : i32
  }
  func.func @transform_8(%arg0: i32) -> (i32, i32, i32) {
    %c0_i32 = arith.constant 0 : i32
    %c0_i32_0 = arith.constant 0 : i32
    %c0_i32_1 = arith.constant 0 : i32
    return %arg0, %c0_i32, %c0_i32_0 : i32, i32, i32
  }
}

</mosaic_0001>

<bundles_post_ra>
// kernel: basic_block_forward.1
= control target key start
LH: loop header
LB: loop body
LE: loop exit
PB: predicated region body
PF: predicated region fallthrough
CT: control target
= control target key end

     0   :  { %v1818_v0 = vmov 0.0   ;;  %s1819_s9 = smov 111   ;;  %s1820_s10 = smov 127   ;;  %v1827_v15 = vmov 0   ;;  %v31_v16 = vlaneseq  ;;  %vm2715_vm14 = vcmask 908288   ;;  %s2699_s0 = inlined_call_operand.vmem [shape: f32[2,4,256], index: 0, kind: input, shape index: {}]   ;;  %s2700_s2 = inlined_call_operand.vmem [shape: f32[8,1], index: 2, kind: input, shape index: {}]   ;;  %s2701_s3 = inlined_call_operand.vmem [shape: f32[8,1], index: 3, kind: input, shape index: {}]   ;;  %s2702_s1 = inlined_call_operand.vmem [shape: bf16[8,36], index: 1, kind: input, shape index: {}]   ;;  %s2703_s5 = inlined_call_operand.vmem [shape: f32[8,1], index: 5, kind: input, shape index: {}]   ;;  %s2704_s6 = inlined_call_operand.vmem [shape: f32[8,1], index: 6, kind: input, shape index: {}]   ;;  %s2705_s4 = inlined_call_operand.vmem [shape: bf16[8,76], index: 4, kind: input, shape index: {}]   ;;  %s2706_s7 = inlined_call_operand.<no memory space> [shape: f32[1], index: 7, kind: input, shape index: {}]   ;;  %s2707_s8 = inlined_call_operand.vmem [shape: bf16[2,8,256], index: 8, kind: output, shape index: {}]  }
   0x1   :  { %220 = vst [vmem:[#allocation2 + $0xc] sm:$0xf] %v1818_v0  ;;  %v1878_v1 = vld [vmem:[%s2699_s0 + $0x8] sm:$0xff]  ;;  %218 = vst [vmem:[#allocation2] sm:$0xf] %v1818_v0  ;;  %v226_v2 = vld [vmem:[%s2699_s0] sm:$0xff]  ;;  %803 = vmatprep.mubr.bf16.mxu0 %v1827_v15  ;;  %844 = vmatprep.mubr.bf16.mxu1 %v1827_v15 }
   0x2   :  { %219 = vst [vmem:[#allocation2 + $0x1c] sm:$0xf] %v1818_v0  ;;  %221 = vst [vmem:[#allocation2 + $0x18] sm:$0xf] %v1818_v0  ;;  %660 = vrot.lane.b32.xlu0 %v226_v2, %s1819_s9  ;;  %v657_v3 = vcombine.high %v226_v2, %v226_v2  ;;  %s1821_s0 = smov 113   ;;  %s1822_s11 = smov 112   ;;  %v612_v12 = vcombine.low %v226_v2, %v226_v2  ;;  %1693 = vset.pattern.permute.xlu1 %v1827_v15 }
   0x3   :  { %1130 = vst [vmem:[#allocation5 + $0x20] sm:$0xff] %v1818_v0  ;;  %230 = vst [vmem:[#allocation2 + $0x10] sm:$0xff] %v1878_v1  ;;  %s1823_s12 = smov 1   ;;  %s1824_s13 = smov 17   ;;  %1692 = vset.pattern.permute.xlu0 %v1827_v15  ;;  %v1949_v17 = vand.u32 127, %v31_v16  ;;  %v410_v37 = vcombine.high %v1878_v1, %v1878_v1  ;;  %v303_v43 = vcombine.low %v1878_v1, %v1878_v1 }
   0x4   :  { %227 = vst [vmem:[#allocation2 + $0x4] sm:$0xff] %v226_v2  ;;  %480 = vst [vmem:[#allocation3 + $0x60] sm:$0xf] %v226_v2  ;;  %s1825_s14 = smov 15   ;;  %s1826_s15 = smov 16  }
   0x5   :  { %481 = vst [vmem:[#allocation3 + $0xa8] sm:$0xf] %v657_v3  ;;  %v33_v19 = vadd.s32 128, %v1949_v17  ;;  %v1956_v21 = vmul.u32.u64.low 2863311531, %v1949_v17  ;;  %v1957_v22 = vmul.u32.u64.high 2863311531, %v1949_v17, %v1956_v21  ;;  %v34_v46 = vadd.s32 256, %v1949_v17 }
   0x6   :  { %v35_v53 = vadd.s32 384, %v1949_v17  ;;  %v2009_v56 = vadd.s32 512, %v1949_v17 }
   0x7   :  { %v1961_v23 = vmul.u32.u64.low 2863311531, %v33_v19  ;;  %v1962_v24 = vmul.u32.u64.high 2863311531, %v33_v19, %v1961_v23  ;;  %v44_v27 = vshrl.u32 %v1957_v22, 8 }
   0x8   :  { %v2002_v50 = vmul.u32.u64.low 2863311531, %v34_v46  ;;  %v2003_v51 = vmul.u32.u64.high 2863311531, %v34_v46, %v2002_v50  ;;  %v2014_v59 = vmul.u32.u64.low 2863311531, %v35_v53  ;;  %v2015_v60 = vmul.u32.u64.high 2863311531, %v35_v53, %v2014_v59 }
   0x9   :  { %v652_v18 = vld [vmem:[#allocation2 + $0x1c] sm:$0xf]  ;;  %v55_v28 = vshrl.u32 %v1962_v24, 8  ;;  %v45_v29 = vmul.u32 384, %v44_v27  ;;  %v403_v41 = vld [vmem:[#allocation2 + $0x18] sm:$0xf] }
   0xa   :  { %v1889_v4 = vld [vmem:[#allocation2 + $0xc] sm:$0xff]  ;;  %v1897_v6 = vld [vmem:[#allocation2 + $0x14] sm:$0xff]  ;;  %v489_v20 = vld [vmem:[#allocation2 + $0x1c] sm:$0xf]  ;;  %v66_v62 = vshrl.u32 %v2003_v51, 8 }
   0xb   :  { %664 = vrot.lane.b32.xlu1 %v1889_v4, %s1819_s9  ;;  %v658_v5 = vcombine.high %v1889_v4, %v1889_v4  ;;  %501 = vrot.lane.b32.xlu0 %v1889_v4, %s1820_s10  ;;  %482 = vst [vmem:[#allocation3 + $0x70] sm:$0xf] %v1889_v4  ;;  %v1902_v7 = vcombine.high %v1897_v6, %v1897_v6  ;;  %484 = vst [vmem:[#allocation3 + $0x8] sm:$0xf] %v1897_v6  ;;  %v400_v9 = vld [vmem:[#allocation2] sm:$0xff]  ;;  %v1917_v11 = vld [vmem:[#allocation2 + $0x8] sm:$0xff] }
   0xc   :  { %v613_v8 = vcombine.low %v1889_v4, %v1889_v4  ;;  %v408_v10 = vcombine.high %v400_v9, %v400_v9  ;;  %v302_v13 = vcombine.low %v1917_v11, %v1917_v11  ;;  %v301_v14 = vcombine.low %v400_v9, %v400_v9  ;;  %v557_v31 = vld [vmem:[#allocation2 + $0x1c] sm:$0xf]  ;;  %v234_v48 = vld [vmem:[#allocation2 + $0x18] sm:$0xf] }
   0xd   :  { %483 = vst [vmem:[#allocation3 + $0x40] sm:$0xf] %v658_v5  ;;  %485 = vst [vmem:[#allocation3 + $0x78] sm:$0xf] %v1902_v7  ;;  %v409_v25 = vcombine.high %v1917_v11, %v1917_v11  ;;  %v614_v26 = vcombine.low %v1897_v6, %v1897_v6  ;;  %v56_v30 = vmul.u32 384, %v55_v28  ;;  %v46_v32 = vsub.s32 %v1949_v17, %v45_v29 }
   0xe   :  { %v1739_v33 = vld [vmem:[#allocation2 + $0x1c] ss:$0 sps:$4 sm:$0xff]   ;;  %v341_v54 = vld [vmem:[#allocation2 + $0x18] sm:$0xf] }
   0xf   :  { %497 = vrot.lane.b32.xlu1 %v226_v2, %s1820_s10  ;;  %662 = vrot.lane.b32.xlu0 %v657_v3, %s1819_s9  ;;  %v57_v34 = vsub.s32 %v33_v19, %v56_v30  ;;  %vm104_vm0 = vcmp.ne.s32.totalorder %v46_v32, 0  ;;  %vm110_vm1 = vcmp.lt.s32.totalorder %v46_v32, 0  ;;  %v122_v35 = vadd.s32 384, %v46_v32  ;;  %v1741_v57 = vld [vmem:[#allocation2 + $0x18] ss:$0 sps:$4 sm:$0xff]  }
  0x10   :  { %vm116_vm4 = vmand %vm110_vm1, %vm104_vm0 }
  0x11   :  { %vm105_vm2 = vcmp.ne.s32.totalorder %v57_v34, 0  ;;  %vm111_vm3 = vcmp.lt.s32.totalorder %v57_v34, 0  ;;  %v123_v36 = vadd.s32 384, %v57_v34  ;;  %v128_v38 = vsel %vm116_vm4, %v122_v35, %v46_v32 }
  0x12   :  { %vm117_vm5 = vmand %vm111_vm3, %vm105_vm2  ;;  %v135_v40 = vsub.s32 0, %v128_v38  ;;  %vm134_vm6 = vcmp.lt.s32.totalorder %v128_v38, 0  ;;  %vm579_vm3 = vcmask 924672  }
  0x13   :  { %569 = vrot.lane.b32.xlu1 %v1889_v4, %s1821_s0  ;;  %567 = vrot.lane.b32.xlu0 %v657_v3, %s1821_s0  ;;  %v129_v39 = vsel %vm117_vm5, %v123_v36, %v57_v34 }
  0x14   :  { %v142_v42 = vsub.s32 0, %v129_v39  ;;  %v1646_v44 = vmin.u32 %v135_v40, %v128_v38  ;;  %vm141_vm7 = vcmp.lt.s32.totalorder %v129_v39, 0 }
  0x16   :  { %v1647_v45 = vmin.u32 %v142_v42, %v129_v39  ;;  %v138_v47 = vand.u32 15, %v1646_v44 }
  0x17   :  { %499 = vrot.lane.b32.xlu1 %v657_v3, %s1820_s10  ;;  %565 = vrot.lane.b32.xlu0 %v226_v2, %s1821_s0 }
  0x18   :  { %v145_v49 = vand.u32 15, %v1647_v45  ;;  %v139_v52 = vsub.s32 0, %v138_v47 }
  0x1a   :  { %v146_v55 = vsub.s32 0, %v145_v49  ;;  %v140_v58 = vsel %vm134_vm6, %v139_v52, %v138_v47  ;;  %vm2714_vm6 = vcmask 1039360  }
  0x1b   :  { %618 = vrot.lane.b32.xlu1 %v226_v2, %s1822_s11  ;;  %620 = vrot.lane.b32.xlu0 %v613_v8, %s1822_s11  ;;  %v2019_v63 = vmul.u32.u64.low 2863311531, %v2009_v56  ;;  %v2020_v2 = vmul.u32.u64.high 2863311531, %v2009_v56, %v2019_v63  ;;  %vm176_vm8 = vcmp.ne.s32.totalorder %v140_v58, 0  ;;  %vm182_vm9 = vcmp.lt.s32.totalorder %v140_v58, 0  ;;  %v892_v8 = vld [vmem:[%s2700_s2] sm:$0xff] }
  0x1c   :  { %v147_v61 = vsel %vm141_vm7, %v146_v55, %v145_v49  ;;  %vm2026_vm12 = vmand %vm182_vm9, %vm176_vm8 }
  0x1d   :  { %vm177_vm10 = vcmp.ne.s32.totalorder %v147_v61, 0  ;;  %vm183_vm11 = vcmp.lt.s32.totalorder %v147_v61, 0  ;;  %v88_v19 = vshrl.u32 %v2020_v2, 8 }
  0x1e   :  { %vm189_vm13 = vmand %vm183_vm11, %vm177_vm10  ;;  %vm2711_vm10 = vcmask 916480   ;;  %vm752_vm11 = vcmask 1041408  }
  0x1f   :  { %413 = vrot.lane.b32.xlu1 %v408_v10, %s1823_s12  ;;  %415 = vrot.lane.b32.xlu0 %v1917_v11, %s1823_s12  ;;  %v89_v23 = vmul.u32 384, %v88_v19 }
  0x23   :  { %616 = vrot.lane.b32.xlu1 %v612_v12, %s1822_s11  ;;  %411 = vrot.lane.b32.xlu0 %v400_v9, %s1823_s12 }
  0x27   :  { %256 = vrot.lane.b32.xlu1 %v408_v10, %s1824_s13  ;;  %258 = vrot.lane.b32.xlu0 %v1917_v11, %s1824_s13 }
  0x2b   :  { %363 = vrot.lane.b32.xlu1 %v408_v10, %s1825_s14  ;;  %365 = vrot.lane.b32.xlu0 %v1917_v11, %s1825_s14  ;;  %v77_v10 = vshrl.u32 %v2015_v60, 8 }
  0x2f   :  { %254 = vrot.lane.b32.xlu1 %v400_v9, %s1824_s13  ;;  %307 = vrot.lane.b32.xlu0 %v400_v9, %s1826_s15 }
  0x33   :  { %309 = vrot.lane.b32.xlu1 %v302_v13, %s1826_s15  ;;  %361 = vrot.lane.b32.xlu0 %v400_v9, %s1825_s14  ;;  %v902_v9 = vld [vmem:[%s2701_s3] sm:$0xff] }
  0x37   :  { %305 = vrot.lane.b32.xlu1 %v301_v14, %s1826_s15  ;;  %666 = vrot.lane.b32.xlu0 %v658_v5, %s1819_s9 }
  0x3b   :  { %668 = vrot.lane.b32.xlu1 %v1897_v6, %s1819_s9  ;;  %503 = vrot.lane.b32.xlu0 %v658_v5, %s1820_s10 }
  0x3f   :  { %505 = vrot.lane.b32.xlu1 %v1897_v6, %s1820_s10  ;;  %670 = vrot.lane.b32.xlu0 %v1902_v7, %s1819_s9 }
  0x43   :  { %672 = vrot.lane.b32.xlu1 %v652_v18, %s1819_s9  ;;  %507 = vrot.lane.b32.xlu0 %v1902_v7, %s1820_s10 }
  0x47   :  { %509 = vrot.lane.b32.xlu1 %v489_v20, %s1820_s10  ;;  %571 = vrot.lane.b32.xlu0 %v658_v5, %s1821_s0  ;;  %v78_v20 = vmul.u32 384, %v77_v10 }
  0x49   :  { %v79_v29 = vsub.s32 %v35_v53, %v78_v20 }
  0x4b   :  { %573 = vrot.lane.b32.xlu1 %v1897_v6, %s1821_s0  ;;  %622 = vrot.lane.b32.xlu0 %v1889_v4, %s1822_s11  ;;  %v67_v4 = vmul.u32 384, %v66_v62  ;;  %vm107_vm7 = vcmp.ne.s32.totalorder %v79_v29, 0  ;;  %vm113_vm8 = vcmp.lt.s32.totalorder %v79_v29, 0 }
  0x4d   :  { %v68_v13 = vsub.s32 %v34_v46, %v67_v4 }
  0x4f   :  { %624 = vrot.lane.b32.xlu1 %v614_v26, %s1822_s11  ;;  %417 = vrot.lane.b32.xlu0 %v409_v25, %s1823_s12  ;;  %vm106_vm1 = vcmp.ne.s32.totalorder %v68_v13, 0  ;;  %vm112_vm2 = vcmp.lt.s32.totalorder %v68_v13, 0  ;;  %v124_v26 = vadd.s32 384, %v68_v13 }
  0x50   :  { %vm118_vm4 = vmand %vm112_vm2, %vm106_vm1  ;;  %vm2709_vm2 = vcmask 7168  }
  0x51   :  { %v2076_v35 = vsel %vm118_vm4, %v124_v26, %v68_v13 }
  0x52   :  { %v149_v40 = vsub.s32 0, %v2076_v35 }
  0x53   :  { %419 = vrot.lane.b32.xlu1 %v1878_v1, %s1823_s12  ;;  %575 = vrot.lane.b32.xlu0 %v1902_v7, %s1821_s0  ;;  %v195_v7 = vadd.s32 16, %v147_v61 }
  0x54   :  { %v1648_v62 = vmin.u32 %v149_v40, %v2076_v35 }
  0x55   :  { %v2049_v18 = vsel %vm189_vm13, %v195_v7, %v147_v61  ;;  %vm2092_vm13 = vmand %vm113_vm8, %vm107_vm7 }
  0x56   :  { %vm2710_vm0 = vcmp.le.s32.totalorder %v2049_v18, 14  ;;  %vm2708_vm5 = vcmp.ge.s32.totalorder %v2049_v18, 1  ;;  %v152_v7 = vand.u32 15, %v1648_v62 }
  0x57   :  { %577 = vrot.lane.b32.xlu1 %v557_v31, %s1821_s0  ;;  %626 = vrot.lane.b32.xlu0 %v1897_v6, %s1822_s11  ;;  %v194_v6 = vadd.s32 16, %v140_v58 }
  0x5b   :  { %628 = vrot.lane.b32.xlu1 %v1739_v33, %s1822_s11  ;;  %260 = vrot.lane.b32.xlu0 %v409_v25, %s1824_s13  ;;  %v90_v33 = vsub.s32 %v2009_v56, %v89_v23 }
  0x5d   :  { %vm114_vm1 = vcmp.lt.s32.totalorder %v90_v33, 0  ;;  %v126_v59 = vadd.s32 384, %v90_v33 }
  0x5f   :  { %262 = vrot.lane.b32.xlu1 %v1878_v1, %s1824_s13  ;;  %367 = vrot.lane.b32.xlu0 %v409_v25, %s1825_s14 }
  0x63   :  { %369 = vrot.lane.b32.xlu1 %v1878_v1, %s1825_s14  ;;  %421 = vrot.lane.b32.xlu0 %v410_v37, %s1823_s12 }
  0x67   :  { %423 = vrot.lane.b32.xlu1 %v403_v41, %s1823_s12  ;;  %311 = vrot.lane.b32.xlu0 %v1917_v11, %s1826_s15  ;;  %v125_v41 = vadd.s32 384, %v79_v29 }
  0x6b   :  { %313 = vrot.lane.b32.xlu1 %v303_v43, %s1826_s15  ;;  %264 = vrot.lane.b32.xlu0 %v410_v37, %s1824_s13 }
  0x6f   :  { %266 = vrot.lane.b32.xlu1 %v234_v48, %s1824_s13  ;;  %371 = vrot.lane.b32.xlu0 %v410_v37, %s1825_s14 }
  0x73   :  { %373 = vrot.lane.b32.xlu1 %v341_v54, %s1825_s14  ;;  %315 = vrot.lane.b32.xlu0 %v1878_v1, %s1826_s15  ;;  %v2024_v1 = vadd.s32 640, %v1949_v17  ;;  %v2047_v17 = vsel %vm2026_vm12, %v194_v6, %v140_v58  ;;  %vm108_vm12 = vcmp.ne.s32.totalorder %v90_v33, 0  ;;  %v2111_v58 = vsel %vm2092_vm13, %v125_v41, %v79_v29 }
  0x74   :  { %v661_v3 = vpop.permute.xlu0 %660  ;;  %vm2713_vm15 = vcmp.le.s32.totalorder %v2047_v17, 14  ;;  %vm2712_vm9 = vcmp.ge.s32.totalorder %v2047_v17, 1  ;;  %vm120_vm4 = vmand %vm114_vm1, %vm108_vm12  ;;  %v156_v63 = vsub.s32 0, %v2111_v58  ;;  %vm268_vm13 = vcmask 138240  }
  0x75   :  { %v2038_v11 = vmul.u32.u64.low 2863311531, %v2024_v1  ;;  %v2039_v12 = vmul.u32.u64.high 2863311531, %v2024_v1, %v2038_v11  ;;  %vm148_vm1 = vcmp.lt.s32.totalorder %v2076_v35, 0 }
  0x77   :  { %317 = vrot.lane.b32.xlu1 %v1741_v57, %s1826_s15  ;;  %895 = vperm.xlu0 %1692, %v892_v8   ;;  %v99_v30 = vshrl.u32 %v2039_v12, 8 }
  0x79   :  { %v100_v37 = vmul.u32 384, %v99_v30 }
  0x7b   :  { %905 = vperm.xlu1 %1693, %v902_v9   ;;  %1705 = vrot.lane.b32.xlu0 %v1818_v0, %s1822_s11  ;;  %v101_v50 = vsub.s32 %v2024_v1, %v100_v37  ;;  %v2127_v1 = vsel %vm120_vm4, %v126_v59, %v90_v33  ;;  %v1649_v9 = vmin.u32 %v156_v63, %v2111_v58  ;;  %vm375_vm4 = vcmask 121856  }
  0x7c   :  { %v163_v10 = vsub.s32 0, %v2127_v1 }
  0x7d   :  { %v2041_v14 = vpop.permute.xlu1 %664  ;;  %v2043_v16 = vpop.permute.xlu0 %501  ;;  %vm109_vm7 = vcmp.ne.s32.totalorder %v101_v50, 0  ;;  %vm115_vm8 = vcmp.lt.s32.totalorder %v101_v50, 0  ;;  %v127_v4 = vadd.s32 384, %v101_v50 }
  0x7e   :  { %vm121_vm12 = vmand %vm115_vm8, %vm109_vm7  ;;  %vm155_vm7 = vcmp.lt.s32.totalorder %v2111_v58, 0 }
  0x7f   :  { %1695 = vrot.lane.b32.xlu1 %v1818_v0, %s1819_s9  ;;  %1720 = vrot.lane.b32.xlu0 %v1818_v0, %s1823_s12  ;;  %v2137_v19 = vsel %vm121_vm12, %v127_v4, %v101_v50 }
  0x80   :  { %v170_v29 = vsub.s32 0, %v2137_v19 }
  0x81   :  { %v498_v21 = vpop.permute.xlu1 %497  ;;  %v663_v22 = vpop.permute.xlu0 %662 }
  0x82   :  { %v675_v24 = vsel %vm2715_vm14, %v661_v3, %v663_v22  ;;  %v676_v25 = vsel %vm2715_vm14, %v663_v22, %v2041_v14 }
  0x83   :  { %v687_v27 = vsel %vm2713_vm15, %v675_v24, 0.0  ;;  %v688_v28 = vsel %vm2710_vm0, %v676_v25, 0.0  ;;  %1700 = vrot.lane.b32.xlu1 %v1818_v0, %s1821_s0  ;;  %986 = vrot.lane.b32.xlu0 %v1818_v0, %s1826_s15  ;;  %v153_v25 = vsub.s32 0, %v152_v7 }
  0x84   :  { %693 = vst [vmem:[#allocation3 + $0x58] sm:$0xf] %v687_v27  ;;  %694 = vst [vmem:[#allocation3 + $0xd0] sm:$0xf] %v688_v28  ;;  %v159_v27 = vand.u32 15, %v1649_v9  ;;  %v1650_v28 = vmin.u32 %v163_v10, %v2127_v1 }
  0x85   :  { %v2071_v31 = vpop.permute.xlu1 %569  ;;  %v568_v32 = vpop.permute.xlu0 %567 }
  0x86   :  { %v581_v34 = vsel %vm579_vm3, %v568_v32, %v2071_v31  ;;  %v160_v37 = vsub.s32 0, %v159_v27 }
  0x87   :  { %v593_v36 = vsel %vm2708_vm5, %v581_v34, 0.0  ;;  %1710 = vrot.lane.b32.xlu1 %v1818_v0, %s1820_s10  ;;  %1212 = vrot.lane.b32.xlu0 %v1818_v0, %s1821_s0 }
  0x88   :  { %599 = vst [vmem:[#allocation3 + $0x10] sm:$0xf] %v593_v36  ;;  %v154_v36 = vsel %vm148_vm1, %v153_v25, %v152_v7  ;;  %vm162_vm1 = vcmp.lt.s32.totalorder %v2127_v1, 0 }
  0x89   :  { %v500_v38 = vpop.permute.xlu1 %499  ;;  %v566_v39 = vpop.permute.xlu0 %565  ;;  %vm178_vm8 = vcmp.ne.s32.totalorder %v154_v36, 0  ;;  %vm184_vm12 = vcmp.lt.s32.totalorder %v154_v36, 0 }
  0x8a   :  { %v512_v42 = vsel %vm2714_vm6, %v498_v21, %v500_v38  ;;  %v513_v43 = vsel %vm2714_vm6, %v500_v38, %v2043_v16  ;;  %v580_v44 = vsel %vm579_vm3, %v566_v39, %v568_v32  ;;  %v166_v38 = vand.u32 15, %v1650_v28 }
  0x8b   :  { %v524_v46 = vsel %vm2713_vm15, %v512_v42, 0.0  ;;  %v525_v47 = vsel %vm2710_vm0, %v513_v43, 0.0  ;;  %v592_v48 = vsel %vm2712_vm9, %v580_v44, 0.0  ;;  %v725_v49 = vld [vmem:[#allocation3 + $0xd0] sm:$0xf]  ;;  %1715 = vrot.lane.b32.xlu1 %v1818_v0, %s1825_s14  ;;  %1160 = vrot.lane.b32.xlu0 %v1818_v0, %s1820_s10  ;;  %v1651_v39 = vmin.u32 %v170_v29, %v2137_v19 }
  0x8c   :  { %v536_v51 = vrot.slane %v524_v46, 4  ;;  %v537_v52 = vrot.slane %v525_v47, 4  ;;  %598 = vst [vmem:[#allocation3 + $0xc0] sm:$0xf] %v592_v48  ;;  %v743_v53 = vpack.c.bf16 %v725_v49, %v725_v49  ;;  %v724_v54 = vld [vmem:[#allocation3 + $0x58] sm:$0xf]  ;;  %v161_v46 = vsel %vm155_vm7, %v160_v37, %v159_v27 }
  0x8d   :  { %v619_v55 = vpop.permute.xlu1 %618  ;;  %v2107_v56 = vpop.permute.xlu0 %620  ;;  %v742_v57 = vpack.c.bf16 %v724_v54, %v724_v54  ;;  %v167_v47 = vsub.s32 0, %v166_v38  ;;  %v173_v48 = vand.u32 15, %v1651_v39  ;;  %vm169_vm7 = vcmp.lt.s32.totalorder %v2137_v19, 0 }
  0x8e   :  { %548 = vst [vmem:[#allocation3 + $0x60] sm:$0xf0] %v536_v51  ;;  %549 = vst [vmem:[#allocation3 + $0xa8] sm:$0xf0] %v537_v52  ;;  %v632_v60 = vsel %vm2711_vm10, %v619_v55, %v2107_v56  ;;  %1653 = vmatprep.subr.msk.bf16.mxu0 %vm752_vm11, %v743_v53  ;;  %v196_v51 = vadd.s32 16, %v154_v36 }
  0x8f   :  { %644 = vst [vmem:[#allocation3 + $0x10] sm:$0xf0] %v632_v60  ;;  %v754_v61 = vsel %vm752_vm11, %v742_v57, 0  ;;  %934 = vrot.lane.b32.xlu1 %v1818_v0, %s1824_s13  ;;  %v168_v54 = vsel %vm162_vm1, %v167_v47, %v166_v38  ;;  %v197_v60 = vadd.s32 16, %v161_v46 }
  0x90   :  { %782 = vmatpush1.bf16.msra.mxu0 %v754_v61  ;;  %vm186_vm1 = vcmp.lt.s32.totalorder %v168_v54, 0 }
  0x91   :  { %v414_v2 = vpop.permute.xlu1 %413  ;;  %v2125_v3 = vpop.permute.xlu0 %415 }
  0x92   :  { %v427_v5 = vsel %vm2709_vm2, %v414_v2, %v2125_v3 }
  0x93   :  { %v439_v6 = vsel %vm2708_vm5, %v427_v5, 0.0  ;;  %1310 = vrot.lane.b32.xlu1 %v1818_v0, %s1819_s9 }
  0x94   :  { %v451_v8 = vrot.slane %v439_v6, 4  ;;  %v198_v6 = vadd.s32 16, %v168_v54 }
  0x95   :  { %v617_v11 = vpop.permute.xlu1 %616  ;;  %v412_v12 = vpop.permute.xlu0 %411  ;;  %v713_v13 = vld [vmem:[#allocation3 + $0xa8] sm:$0xff]  ;;  %v712_v35 = vld [vmem:[#allocation3 + $0x60] sm:$0xff] }
  0x96   :  { %463 = vst [vmem:[#allocation3 + $0x48] sm:$0xf0] %v451_v8  ;;  %v631_v20 = vsel %vm2711_vm10, %v617_v11, %v619_v55  ;;  %v426_v21 = vsel %vm2709_vm2, %v412_v12, %v414_v2  ;;  %v719_v22 = vld [vmem:[#allocation3 + $0x10] sm:$0xff]  ;;  %vm2723_vm2 = vcmask 130048   ;;  %vm185_vm10 = vcmp.lt.s32.totalorder %v161_v46, 0 }
  0x97   :  { %643 = vst [vmem:[#allocation3 + $0xc0] sm:$0xf0] %v631_v20  ;;  %v438_v23 = vsel %vm2712_vm9, %v426_v21, 0.0  ;;  %v737_v24 = vpack.c.bf16 %v719_v22, %v713_v13  ;;  %1264 = vrot.lane.b32.xlu1 %v1818_v0, %s1822_s11  ;;  %v174_v55 = vsub.s32 0, %v173_v48 }
  0x98   :  { %v450_v26 = vrot.slane %v438_v23, 4 }
  0x99   :  { %v257_v30 = vpop.permute.xlu1 %256  ;;  %783 = vmatprep.subr.bf16.mxu0 %v737_v24  ;;  %v2147_v32 = vpop.permute.xlu0 %258  ;;  %v175_v2 = vsel %vm169_vm7, %v174_v55, %v173_v48 }
  0x9a   :  { %462 = vst [vmem:[#allocation3 + $0x30] sm:$0xf0] %v450_v26  ;;  %v270_v33 = vsel %vm268_vm13, %v257_v30, %v2147_v32  ;;  %v199_v13 = vadd.s32 16, %v175_v2 }
  0x9b   :  { %v282_v34 = vsel %vm2708_vm5, %v270_v33, 0.0  ;;  %vm190_vm5 = vmand %vm184_vm12, %vm178_vm8  ;;  %vm180_vm12 = vcmp.ne.s32.totalorder %v168_v54, 0 }
  0x9c   :  { %288 = vst [vmem:[#allocation3] sm:$0xf] %v282_v34  ;;  %v2168_v59 = vsel %vm190_vm5, %v196_v51, %v154_v36  ;;  %vm181_vm5 = vcmp.ne.s32.totalorder %v175_v2, 0 }
  0x9d   :  { %v364_v40 = vpop.permute.xlu1 %363  ;;  %v2155_v41 = vpop.permute.xlu0 %365 }
  0x9e   :  { %v718_v42 = vld [vmem:[#allocation3 + $0xc0] sm:$0xff]  ;;  %v377_v43 = vsel %vm375_vm4, %v364_v40, %v2155_v41 }
  0x9f   :  { %v736_v44 = vpack.c.bf16 %v718_v42, %v712_v35  ;;  %v389_v45 = vsel %vm2710_vm0, %v377_v43, 0.0  ;;  %vm179_vm0 = vcmp.ne.s32.totalorder %v161_v46, 0  ;;  %v2207_v42 = vld [vmem:[%s2702_s1] sm:$0xf] }
  0xa0   :  { %395 = vst [vmem:[#allocation3 + $0x48] sm:$0xf] %v389_v45  ;;  %vm191_vm8 = vmand %vm185_vm10, %vm179_vm0  ;;  %vm187_vm10 = vcmp.lt.s32.totalorder %v175_v2, 0 }
  0xa1   :  { %784 = vmatpush1.bf16.msra.mxu0 %v736_v44  ;;  %v255_v49 = vpop.permute.xlu1 %254  ;;  %v308_v50 = vpop.permute.xlu0 %307  ;;  %v2177_v5 = vsel %vm191_vm8, %v197_v60, %v161_v46  ;;  %vm192_vm0 = vmand %vm186_vm1, %vm180_vm12 }
  0xa2   :  { %v269_v52 = vsel %vm268_vm13, %v255_v49, %v257_v30  ;;  %vm2722_vm7 = vcmp.le.s32.totalorder %v2177_v5, 14  ;;  %v2185_v12 = vsel %vm192_vm0, %v198_v6, %v168_v54  ;;  %vm193_vm8 = vmand %vm187_vm10, %vm181_vm5  ;;  %vm748_vm0 = vcmask 293888  }
  0xa3   :  { %v281_v53 = vsel %vm2712_vm9, %v269_v52, 0.0  ;;  %vm214_vm9 = vcmp.le.s32.totalorder %v2168_v59, 14  ;;  %vm2721_vm12 = vcmp.le.s32.totalorder %v2185_v12, 14  ;;  %v2195_v28 = vsel %vm193_vm8, %v199_v13, %v175_v2 }
  0xa4   :  { %287 = vst [vmem:[#allocation3 + $0xb0] sm:$0xf] %v281_v53  ;;  %vm2716_vm1 = vcmp.le.s32.totalorder %v2195_v28, 14  ;;  %vm2718_vm5 = vcmp.ge.s32.totalorder %v2168_v59, 1  ;;  %vm2719_vm10 = vcmp.ge.s32.totalorder %v2177_v5, 1  ;;  %vm2728_vm8 = vcmask 916480  }
  0xa5   :  { %v2166_v57 = vpop.permute.xlu1 %309  ;;  %v362_v58 = vpop.permute.xlu0 %361 }
  0xa6   :  { %v321_v61 = vsel %vm2723_vm2, %v308_v50, %v2166_v57  ;;  %v376_v62 = vsel %vm375_vm4, %v362_v58, %v364_v40 }
  0xa7   :  { %333 = vst [vmem:[#allocation3] sm:$0xf0] %v321_v61  ;;  %v388_v63 = vsel %vm2713_vm15, %v376_v62, 0.0  ;;  %v707_v21 = vld [vmem:[#allocation3 + $0x48] sm:$0xff]  ;;  %vm2729_vm15 = vmmov %vm2728_vm8 }
  0xa8   :  { %394 = vst [vmem:[#allocation3 + $0x30] sm:$0xf] %v388_v63 }
  0xa9   :  { %v306_v1 = vpop.permute.xlu1 %305  ;;  %v667_v4 = vpop.permute.xlu0 %666 }
  0xaa   :  { %v320_v7 = vsel %vm2723_vm2, %v306_v1, %v308_v50  ;;  %v677_v8 = vsel %vm2715_vm14, %v2041_v14, %v667_v4 }
  0xab   :  { %332 = vst [vmem:[#allocation3 + $0xb0] sm:$0xf0] %v320_v7  ;;  %v689_v9 = vsel %vm214_vm9, %v677_v8, 0.0 }
  0xac   :  { %695 = vst [vmem:[#allocation3 + $0x98] sm:$0xf] %v689_v9 }
  0xad   :  { %v669_v10 = vpop.permute.xlu1 %668  ;;  %v504_v11 = vpop.permute.xlu0 %503 }
  0xae   :  { %v678_v19 = vsel %vm2715_vm14, %v667_v4, %v669_v10  ;;  %v514_v14 = vsel %vm2714_vm6, %v2043_v16, %v504_v11  ;;  %v701_v20 = vld [vmem:[#allocation3] sm:$0xff] }
  0xaf   :  { %v690_v22 = vsel %vm2722_vm7, %v678_v19, 0.0  ;;  %v526_v23 = vsel %vm214_vm9, %v514_v14, 0.0  ;;  %v731_v24 = vpack.c.bf16 %v707_v21, %v701_v20  ;;  %v706_v33 = vld [vmem:[#allocation3 + $0x30] sm:$0xff] }
  0xb0   :  { %696 = vst [vmem:[#allocation3 + $0xc8] sm:$0xf] %v690_v22  ;;  %v538_v25 = vrot.slane %v526_v23, 4 }
  0xb1   :  { %785 = vmatprep.subr.bf16.mxu0 %v731_v24  ;;  %v506_v26 = vpop.permute.xlu1 %505  ;;  %v671_v27 = vpop.permute.xlu0 %670 }
  0xb2   :  { %550 = vst [vmem:[#allocation3 + $0x70] sm:$0xf0] %v538_v25  ;;  %v515_v16 = vsel %vm2714_vm6, %v504_v11, %v506_v26  ;;  %v679_v29 = vsel %vm2715_vm14, %v669_v10, %v671_v27  ;;  %v700_v30 = vld [vmem:[#allocation3 + $0xb0] sm:$0xff] }
  0xb3   :  { %v527_v34 = vsel %vm2722_vm7, %v515_v16, 0.0  ;;  %v691_v36 = vsel %vm2721_vm12, %v679_v29, 0.0  ;;  %v730_v37 = vpack.c.bf16 %v706_v33, %v700_v30  ;;  %v726_v38 = vld [vmem:[#allocation3 + $0x98] sm:$0xf] }
  0xb4   :  { %v539_v39 = vrot.slane %v527_v34, 4  ;;  %697 = vst [vmem:[#allocation3 + $0xe0] sm:$0xf] %v691_v36  ;;  %v744_v45 = vpack.c.bf16 %v726_v38, %v726_v38 }
  0xb5   :  { %v673_v40 = vpop.permute.xlu1 %672  ;;  %786 = vmatpush1.bf16.msra.mxu0 %v730_v37  ;;  %v508_v35 = vpop.permute.xlu0 %507 }
  0xb6   :  { %551 = vst [vmem:[#allocation3 + $0x40] sm:$0xf0] %v539_v39  ;;  %v680_v43 = vsel %vm2715_vm14, %v671_v27, %v673_v40  ;;  %v516_v44 = vsel %vm2714_vm6, %v506_v26, %v508_v35  ;;  %v760_v54 = vsel %vm752_vm11, %v744_v45, 0 }
  0xb7   :  { %v692_v46 = vsel %vm2716_vm1, %v680_v43, 0.0  ;;  %v528_v47 = vsel %vm2721_vm12, %v516_v44, 0.0  ;;  %v727_v48 = vld [vmem:[#allocation3 + $0xc8] sm:$0xf] }
  0xb8   :  { %698 = vst [vmem:[#allocation3 + $0x20] sm:$0xf] %v692_v46  ;;  %v540_v49 = vrot.slane %v528_v47, 4  ;;  %1654 = vmatmul.mubr.msk.bf16.vlgmr.msra.gmra.mxu0 %vm748_vm0, %v2207_v42  ;;  %v745_v50 = vpack.c.bf16 %v727_v48, %v727_v48 }
  0xb9   :  { %v510_v51 = vpop.permute.xlu1 %509  ;;  %v572_v52 = vpop.permute.xlu0 %571  ;;  %884 = vmatprep.mubr.bf16.mxu0 %v1827_v15  ;;  %v714_v38 = vld [vmem:[#allocation3 + $0x70] sm:$0xff] }
  0xba   :  { %552 = vst [vmem:[#allocation3 + $0x8] sm:$0xf0] %v540_v49  ;;  %v517_v53 = vsel %vm2714_vm6, %v508_v35, %v510_v51  ;;  %1655 = vmatprep.subr.msk.bf16.mxu1 %vm752_vm11, %v745_v50  ;;  %v582_v55 = vsel %vm579_vm3, %v2071_v31, %v572_v52  ;;  %vm2730_vm6 = vcmask 7168  }
  0xbb   :  { %v529_v58 = vsel %vm2716_vm1, %v517_v53, 0.0  ;;  %823 = vmatpush1.bf16.msra.mxu1 %v760_v54  ;;  %v594_v60 = vsel %vm2718_vm5, %v582_v55, 0.0  ;;  %v728_v61 = vld [vmem:[#allocation3 + $0xe0] sm:$0xf]  ;;  %vm2731_vm14 = vmmov %vm2730_vm6 }
  0xbc   :  { %v541_v62 = vrot.slane %v529_v58, 4  ;;  %600 = vst [vmem:[#allocation3 + $0x38] sm:$0xf] %v594_v60  ;;  %v746_v4 = vpack.c.bf16 %v728_v61, %v728_v61 }
  0xbd   :  { %v574_v63 = vpop.permute.xlu1 %573  ;;  %v623_v2 = vpop.permute.xlu0 %622  ;;  %v715_v33 = vld [vmem:[#allocation3 + $0x40] sm:$0xff] }
  0xbe   :  { %553 = vst [vmem:[#allocation3 + $0x78] sm:$0xf0] %v541_v62  ;;  %v583_v1 = vsel %vm579_vm3, %v572_v52, %v574_v63  ;;  %v633_v31 = vsel %vm2728_vm8, %v2107_v56, %v623_v2  ;;  %v766_v13 = vsel %vm752_vm11, %v746_v4, 0  ;;  %vm2717_vm8 = vcmp.ge.s32.totalorder %v2185_v12, 1 }
  0xbf   :  { %v595_v6 = vsel %vm2719_vm10, %v583_v1, 0.0  ;;  %645 = vst [vmem:[#allocation3 + $0x38] sm:$0xf0] %v633_v31  ;;  %v729_v7 = vld [vmem:[#allocation3 + $0x20] sm:$0xf] }
  0xc0   :  { %601 = vst [vmem:[#allocation3 + $0x28] sm:$0xf] %v595_v6  ;;  %v747_v8 = vpack.c.bf16 %v729_v7, %v729_v7 }
  0xc1   :  { %v625_v9 = vpop.permute.xlu1 %624  ;;  %v418_v10 = vpop.permute.xlu0 %417 }
  0xc2   :  { %v634_v11 = vsel %vm2729_vm15, %v623_v2, %v625_v9  ;;  %1657 = vmatprep.subr.msk.bf16.mxu0 %vm752_vm11, %v747_v8  ;;  %v428_v19 = vsel %vm2730_vm6, %v2125_v3, %v418_v10  ;;  %vm2720_vm15 = vcmp.ge.s32.totalorder %v2195_v28, 1  ;;  %vm2732_vm6 = vcmask 916480  }
  0xc3   :  { %646 = vst [vmem:[#allocation3 + $0x28] sm:$0xf0] %v634_v11  ;;  %863 = vmatpush1.bf16.msra.mxu0 %v766_v13  ;;  %v440_v56 = vsel %vm2718_vm5, %v428_v19, 0.0  ;;  %vm2734_vm11 = vcmask 7168  }
  0xc4   :  { %v452_v14 = vrot.slane %v440_v56, 4 }
  0xc5   :  { %v420_v20 = vpop.permute.xlu1 %419  ;;  %v576_v21 = vpop.permute.xlu0 %575  ;;  %v717_v58 = vld [vmem:[#allocation3 + $0x78] sm:$0xff] }
  0xc6   :  { %464 = vst [vmem:[#allocation3 + $0x80] sm:$0xf0] %v452_v14  ;;  %v429_v22 = vsel %vm2731_vm14, %v418_v10, %v420_v20  ;;  %v584_v23 = vsel %vm579_vm3, %v574_v63, %v576_v21  ;;  %v720_v16 = vld [vmem:[#allocation3 + $0x38] sm:$0xff]  ;;  %vm2733_vm14 = vmmov %vm2732_vm6  ;;  %v716_v63 = vld [vmem:[#allocation3 + $0x8] sm:$0xff] }
  0xc7   :  { %v441_v24 = vsel %vm2719_vm10, %v429_v22, 0.0  ;;  %v596_v3 = vsel %vm2717_vm8, %v584_v23, 0.0  ;;  %v738_v39 = vpack.c.bf16 %v720_v16, %v714_v38 }
  0xc8   :  { %v453_v25 = vrot.slane %v441_v24, 4  ;;  %602 = vst [vmem:[#allocation3 + $0x90] sm:$0xf] %v596_v3 }
  0xc9   :  { %v578_v26 = vpop.permute.xlu1 %577  ;;  %v627_v27 = vpop.permute.xlu0 %626 }
  0xca   :  { %465 = vst [vmem:[#allocation3 + $0x88] sm:$0xf0] %v453_v25  ;;  %v585_v29 = vsel %vm579_vm3, %v576_v21, %v578_v26  ;;  %v635_v30 = vsel %vm2732_vm6, %v625_v9, %v627_v27  ;;  %v721_v34 = vld [vmem:[#allocation3 + $0x28] sm:$0xff]  ;;  %vm2735_vm6 = vmmov %vm2734_vm11 }
  0xcb   :  { %v597_v36 = vsel %vm2720_vm15, %v585_v29, 0.0  ;;  %647 = vst [vmem:[#allocation3 + $0x90] sm:$0xf0] %v635_v30  ;;  %v739_v37 = vpack.c.bf16 %v721_v34, %v715_v33 }
  0xcc   :  { %603 = vst [vmem:[#allocation3 + $0xa0] sm:$0xf] %v597_v36 }
  0xcd   :  { %824 = vmatprep.subr.bf16.mxu1 %v739_v37  ;;  %v629_v40 = vpop.permute.xlu1 %628  ;;  %v261_v35 = vpop.permute.xlu0 %260 }
  0xce   :  { %v636_v43 = vsel %vm2733_vm14, %v627_v27, %v629_v40  ;;  %825 = vmatpush1.bf16.msra.mxu1 %v738_v39  ;;  %v271_v44 = vsel %vm268_vm13, %v2147_v32, %v261_v35  ;;  %vm2737_vm14 = vcmask 1039360  }
  0xcf   :  { %648 = vst [vmem:[#allocation3 + $0xa0] sm:$0xf0] %v636_v43  ;;  %v283_v45 = vsel %vm2718_vm5, %v271_v44, 0.0  ;;  %vm2747_vm5 = vcmp.ge.s32.totalorder %v2049_v18, 1 }
  0xd0   :  { %289 = vst [vmem:[#allocation3 + $0xd8] sm:$0xf] %v283_v45 }
  0xd1   :  { %v263_v46 = vpop.permute.xlu1 %262  ;;  %v368_v47 = vpop.permute.xlu0 %367 }
  0xd2   :  { %v272_v48 = vsel %vm268_vm13, %v261_v35, %v263_v46  ;;  %v378_v49 = vsel %vm375_vm4, %v2155_v41, %v368_v47  ;;  %v722_v53 = vld [vmem:[#allocation3 + $0x90] sm:$0xff] }
  0xd3   :  { %v284_v50 = vsel %vm2719_vm10, %v272_v48, 0.0  ;;  %v390_v51 = vsel %vm214_vm9, %v378_v49, 0.0  ;;  %v740_v1 = vpack.c.bf16 %v722_v53, %v716_v63 }
  0xd4   :  { %290 = vst [vmem:[#allocation3 + $0x18] sm:$0xf] %v284_v50  ;;  %396 = vst [vmem:[#allocation3 + $0x80] sm:$0xf] %v390_v51 }
  0xd5   :  { %v370_v32 = vpop.permute.xlu1 %369  ;;  %v422_v52 = vpop.permute.xlu0 %421 }
  0xd6   :  { %v379_v54 = vsel %vm375_vm4, %v368_v47, %v370_v32  ;;  %v430_v55 = vsel %vm2734_vm11, %v420_v20, %v422_v52  ;;  %v723_v60 = vld [vmem:[#allocation3 + $0xa0] sm:$0xff]  ;;  %vm2738_vm11 = vcmask 916480  }
  0xd7   :  { %v391_v41 = vsel %vm2722_vm7, %v379_v54, 0.0  ;;  %v442_v61 = vsel %vm2717_vm8, %v430_v55, 0.0  ;;  %v741_v62 = vpack.c.bf16 %v723_v60, %v717_v58 }
  0xd8   :  { %397 = vst [vmem:[#allocation3 + $0x88] sm:$0xf] %v391_v41  ;;  %v454_v2 = vrot.slane %v442_v61, 4 }
  0xd9   :  { %864 = vmatprep.subr.bf16.mxu0 %v741_v62  ;;  %v424_v31 = vpop.permute.xlu1 %423  ;;  %v312_v4 = vpop.permute.xlu0 %311 }
  0xda   :  { %466 = vst [vmem:[#allocation3 + $0xe8] sm:$0xf0] %v454_v2  ;;  %v431_v6 = vsel %vm2735_vm6, %v422_v52, %v424_v31  ;;  %865 = vmatpush1.bf16.msra.mxu0 %v740_v1  ;;  %v322_v7 = vsel %vm2723_vm2, %v2166_v57, %v312_v4  ;;  %v1338_v31 = vld [vmem:[#allocation2 + $0x14] sm:$0xff] }
  0xdb   :  { %v443_v8 = vsel %vm2720_vm15, %v431_v6, 0.0  ;;  %334 = vst [vmem:[#allocation3 + $0xd8] sm:$0xf0] %v322_v7  ;;  %v708_v34 = vld [vmem:[#allocation3 + $0x80] sm:$0xff]  ;;  %v1344_v6 = vcombine.high %v1338_v31, %v1338_v31  ;;  %1352 = vst [vmem:[#allocation5 + $0x140] sm:$0xf] %v1338_v31 }
  0xdc   :  { %v455_v9 = vrot.slane %v443_v8, 4 }
  0xdd   :  { %v314_v10 = vpop.permute.xlu1 %313  ;;  %v265_v11 = vpop.permute.xlu0 %264  ;;  %1353 = vst [vmem:[#allocation5 + $0x78] sm:$0xf] %v1344_v6 }
  0xde   :  { %467 = vst [vmem:[#allocation3 + $0xb8] sm:$0xf0] %v455_v9  ;;  %v323_v13 = vsel %vm2723_vm2, %v312_v4, %v314_v10  ;;  %v273_v19 = vsel %vm268_vm13, %v263_v46, %v265_v11  ;;  %v1336_v9 = vld [vmem:[#allocation2 + $0x4] sm:$0xff] }
  0xdf   :  { %335 = vst [vmem:[#allocation3 + $0x18] sm:$0xf0] %v323_v13  ;;  %v285_v56 = vsel %vm2717_vm8, %v273_v19, 0.0  ;;  %v709_v29 = vld [vmem:[#allocation3 + $0x88] sm:$0xff]  ;;  %1348 = vst [vmem:[#allocation5 + $0x58] sm:$0xf] %v1336_v9 }
  0xe0   :  { %291 = vst [vmem:[#allocation3 + $0x50] sm:$0xf] %v285_v56  ;;  %vm1449_vm8 = vcmask 1045504  }
  0xe1   :  { %v267_v14 = vpop.permute.xlu1 %266  ;;  %v372_v20 = vpop.permute.xlu0 %371 }
  0xe2   :  { %v274_v57 = vsel %vm268_vm13, %v265_v11, %v267_v14  ;;  %v380_v21 = vsel %vm375_vm4, %v370_v32, %v372_v20  ;;  %v702_v25 = vld [vmem:[#allocation3 + $0xd8] sm:$0xff] }
  0xe3   :  { %v286_v22 = vsel %vm2720_vm15, %v274_v57, 0.0  ;;  %v392_v23 = vsel %vm2721_vm12, %v380_v21, 0.0  ;;  %v732_v36 = vpack.c.bf16 %v708_v34, %v702_v25  ;;  %vm2756_vm15 = vcmp.le.s32.totalorder %v2047_v17, 14 }
  0xe4   :  { %292 = vst [vmem:[#allocation3 + $0x68] sm:$0xf] %v286_v22  ;;  %398 = vst [vmem:[#allocation3 + $0xe8] sm:$0xf] %v392_v23 }
  0xe5   :  { %v374_v24 = vpop.permute.xlu1 %373  ;;  %v316_v3 = vpop.permute.xlu0 %315 }
  0xe6   :  { %v381_v26 = vsel %vm375_vm4, %v372_v20, %v374_v24  ;;  %v324_v27 = vsel %vm2723_vm2, %v314_v10, %v316_v3  ;;  %v703_v16 = vld [vmem:[#allocation3 + $0x18] sm:$0xff]  ;;  %v1342_v10 = vcombine.high %v1336_v9, %v1336_v9  ;;  %v1337_v24 = vld [vmem:[#allocation2 + $0xc] sm:$0xff] }
  0xe7   :  { %v393_v30 = vsel %vm2716_vm1, %v381_v26, 0.0  ;;  %336 = vst [vmem:[#allocation3 + $0x50] sm:$0xf0] %v324_v27  ;;  %v733_v33 = vpack.c.bf16 %v709_v29, %v703_v16  ;;  %1350 = vst [vmem:[#allocation5 + $0x8] sm:$0xf] %v1337_v24  ;;  %v1343_v29 = vcombine.high %v1337_v24, %v1337_v24 }
  0xe8   :  { %399 = vst [vmem:[#allocation3 + $0xb8] sm:$0xf] %v393_v30  ;;  %1349 = vst [vmem:[#allocation5 + $0x168] sm:$0xf] %v1342_v10 }
  0xe9   :  { %826 = vmatprep.subr.bf16.mxu1 %v733_v33  ;;  %v318_v37 = vpop.permute.xlu1 %317  ;;  %1351 = vst [vmem:[#allocation5 + $0x18] sm:$0xf] %v1343_v29 }
  0xea   :  { %v325_v38 = vsel %vm2723_vm2, %v316_v3, %v318_v37  ;;  %827 = vmatpush1.bf16.msra.mxu1 %v732_v36 }
  0xeb   :  { %337 = vst [vmem:[#allocation3 + $0x68] sm:$0xf0] %v325_v38  ;;  %v710_v44 = vld [vmem:[#allocation3 + $0xe8] sm:$0xff] }
  0xed   :  { %1656 = vmatmul.mubr.msk.bf16.vlgmr.msra.gmra.mxu1 %vm748_vm0, %v2207_v42 }
  0xee   :  { %1500 = vmatprep.mubr.bf16.mxu1 %v1827_v15  ;;  %v704_v39 = vld [vmem:[#allocation3 + $0x50] sm:$0xff] }
  0xef   :  { %v711_v35 = vld [vmem:[#allocation3 + $0xb8] sm:$0xff]  ;;  %v734_v45 = vpack.c.bf16 %v710_v44, %v704_v39  ;;  %v1599_v44 = vld [vmem:[%s2704_s6] sm:$0xff] }
  0xf2   :  { %v705_v40 = vld [vmem:[#allocation3 + $0x68] sm:$0xff]  ;;  %v2299_v47 = vpop.permute.xlu0 %895 }
  0xf3   :  { %v735_v43 = vpack.c.bf16 %v711_v35, %v705_v40 }
  0xf5   :  { %866 = vmatprep.subr.bf16.mxu0 %v735_v43  ;;  %v2405_v43 = vld [vmem:[#allocation5 + $0x20] sm:$0xff] }
  0xf6   :  { %867 = vmatpush1.bf16.msra.mxu0 %v734_v45  ;;  %v2297_v46 = vpop.permute.xlu1 %905  ;;  %v2305_v50 = vpop.permute.xlu0 %1705 }
  0xf7   :  { %v1708_v63 = vunpack.i.h.bf16 %v2305_v50 }
  0xf9   :  { %1658 = vmatmul.mubr.msk.bf16.vlgmr.msra.gmra.mxu0 %vm748_vm0, %v2207_v42  ;;  %vm2736_vm0 = vcmask 908288  }
  0xfa   :  { %1541 = vmatprep.mubr.bf16.mxu0 %v1827_v15  ;;  %v2301_v48 = vpop.permute.xlu1 %1695  ;;  %v2309_v32 = vpop.permute.xlu0 %1720  ;;  %vm2739_vm6 = vmmov %vm2736_vm0 }
  0xfb   :  { %v1698_v58 = vunpack.i.h.bf16 %v2301_v48  ;;  %v1722_v9 = vunpack.i.l.bf16 %v2309_v32 }
  0xfe   :  { %v2303_v49 = vpop.permute.xlu1 %1700  ;;  %v2313_v53 = vpop.permute.xlu0 %986 }
  0xff   :  { %v1703_v42 = vunpack.i.h.bf16 %v2303_v49 }
 0x102   :  { %v2307_v51 = vpop.permute.xlu1 %1710  ;;  %v1213_v55 = vpop.permute.xlu0 %1212 }
 0x103   :  { %v1713_v60 = vunpack.i.h.bf16 %v2307_v51  ;;  %v2323_v41 = vsel %vm579_vm3, %v1703_v42, %v1213_v55 }
 0x106   :  { %v2311_v52 = vpop.permute.xlu1 %1715  ;;  %v1161_v62 = vpop.permute.xlu0 %1160 }
 0x107   :  { %v2332_v1 = vsel %vm2737_vm14, %v1713_v60, %v1161_v62  ;;  %vm2740_vm14 = vcmask 7168  }
 0x10a   :  { %v2316_v54 = vpop.permute.xlu1 %934 }
 0x10e   :  { %v1311_v61 = vpop.permute.xlu1 %1310 }
 0x10f   :  { %v1317_v2 = vsel %vm2736_vm0, %v1698_v58, %v1311_v61  ;;  %v1717_v61 = vunpack.i.l.bf16 %v2311_v52 }
 0x110   :  { %v2336_v4 = vsel %vm2716_vm1, %v1317_v2, 0.0  ;;  %vm2742_vm1 = vcmp.le.s32.totalorder %v2049_v18, 14 }
 0x112   :  { %v1265_v7 = vpop.permute.xlu1 %1264 }
 0x113   :  { %v2341_v8 = vsel %vm2738_vm11, %v1708_v63, %v1265_v7  ;;  %v1697_v7 = vunpack.i.l.bf16 %v2301_v48  ;;  %vm2741_vm11 = vcmp.le.s32.totalorder %v2047_v17, 14 }
 0x178   :  { %v805_v11 = vpop.f32.mrf.mxu0 }
 0x179   :  { %v898_v13 = vmul.f32 %v2299_v47, %v805_v11 }
 0x17a   :  { %v807_v19 = vpop.f32.mrf.mxu0 }
 0x17b   :  { %v908_v56 = vadd.f32 %v2297_v46, %v898_v13  ;;  %v899_v14 = vmul.f32 %v2299_v47, %v807_v19  ;;  %v1410_v13 = vld [vmem:[#allocation5 + $0x168] sm:$0xf]  ;;  %v1409_v19 = vld [vmem:[#allocation5 + $0x58] sm:$0xf] }
 0x17c   :  { %v809_v20 = vpop.f32.mrf.mxu0 }
 0x17d   :  { %v2346_v57 = vmax.f32 %v908_v56, 0.0  ;;  %v909_v21 = vadd.f32 %v2297_v46, %v899_v14 }
 0x17e   :  { %v810_v22 = vpop.f32.mrf.mxu0 }
 0x17f   :  { %1200 = vrot.lane.b32.xlu0 %v2346_v57, %s1821_s0  ;;  %1298 = vrot.lane.b32.xlu1 %v2346_v57, %s1819_s9  ;;  %v2353_v23 = vmax.f32 %v909_v21, 0.0  ;;  %v1702_v22 = vunpack.i.l.bf16 %v2303_v49 }
 0x183   :  { %1148 = vrot.lane.b32.xlu0 %v2346_v57, %s1820_s10  ;;  %1252 = vrot.lane.b32.xlu1 %v2346_v57, %s1822_s11 }
 0x187   :  { %988 = vrot.lane.b32.xlu0 %v2346_v57, %s1826_s15  ;;  %1034 = vrot.lane.b32.xlu1 %v2346_v57, %s1825_s14 }
 0x18b   :  { %1300 = vrot.lane.b32.xlu0 %v2353_v23, %s1819_s9  ;;  %1086 = vrot.lane.b32.xlu1 %v2346_v57, %s1823_s12 }
 0x18f   :  { %1202 = vrot.lane.b32.xlu0 %v2353_v23, %s1821_s0  ;;  %936 = vrot.lane.b32.xlu1 %v2346_v57, %s1824_s13 }
 0x193   :  { %1150 = vrot.lane.b32.xlu0 %v2353_v23, %s1820_s10  ;;  %1254 = vrot.lane.b32.xlu1 %v2353_v23, %s1822_s11 }
 0x197   :  { %1036 = vrot.lane.b32.xlu0 %v2353_v23, %s1825_s14  ;;  %990 = vrot.lane.b32.xlu1 %v2353_v23, %s1826_s15 }
 0x19b   :  { %1088 = vrot.lane.b32.xlu0 %v2353_v23, %s1823_s12 }
 0x19f   :  { %938 = vrot.lane.b32.xlu0 %v2353_v23, %s1824_s13 }
 0x1ad   :  { %v846_v3 = vpop.f32.mrf.mxu1 }
 0x1af   :  { %v847_v25 = vpop.f32.mrf.mxu1 }
 0x1b0   :  { %v900_v26 = vmul.f32 %v2299_v47, %v847_v25 }
 0x1b1   :  { %v849_v27 = vpop.f32.mrf.mxu1 }
 0x1b2   :  { %v910_v16 = vadd.f32 %v2297_v46, %v900_v26 }
 0x1b3   :  { %v850_v30 = vpop.f32.mrf.mxu1 }
 0x1b4   :  { %v2385_v33 = vmax.f32 %v910_v16, 0.0 }
 0x1b6   :  { %1206 = vrot.lane.b32.xlu0 %v2385_v33, %s1821_s0  ;;  %1304 = vrot.lane.b32.xlu1 %v2385_v33, %s1819_s9 }
 0x1b9   :  { %v886_v34 = vpop.f32.mrf.mxu0 }
 0x1ba   :  { %v901_v36 = vmul.f32 %v2299_v47, %v886_v34  ;;  %1258 = vrot.lane.b32.xlu0 %v2385_v33, %s1822_s11  ;;  %1040 = vrot.lane.b32.xlu1 %v2385_v33, %s1825_s14  ;;  %v1707_v34 = vunpack.i.l.bf16 %v2305_v50  ;;  %v1771_v50 = vpack.c.bf16 %v2341_v8, %v2323_v41 }
 0x1bb   :  { %v888_v37 = vpop.f32.mrf.mxu0 }
 0x1bc   :  { %v911_v38 = vadd.f32 %v2297_v46, %v901_v36  ;;  %v1712_v36 = vunpack.i.l.bf16 %v2307_v51 }
 0x1bd   :  { %v889_v39 = vpop.f32.mrf.mxu0 }
 0x1be   :  { %v2397_v40 = vmax.f32 %v911_v38, 0.0  ;;  %1154 = vrot.lane.b32.xlu0 %v2385_v33, %s1820_s10  ;;  %1725 = vrot.lane.b32.xlu1 %v1818_v0, %s1824_s13  ;;  %v1589_v0 = vld [vmem:[%s2703_s5] sm:$0xff] }
 0x1bf   :  { %v890_v35 = vpop.f32.mrf.mxu0 }
 0x1c2   :  { %1092 = vrot.lane.b32.xlu0 %v2385_v33, %s1823_s12  ;;  %992 = vrot.lane.b32.xlu1 %v2405_v43, %s1826_s15 }
 0x1c6   :  { %1306 = vrot.lane.b32.xlu0 %v2397_v40, %s1819_s9  ;;  %1208 = vrot.lane.b32.xlu1 %v2397_v40, %s1821_s0 }
 0x1ca   :  { %1044 = vrot.lane.b32.xlu0 %v2405_v43, %s1825_s14  ;;  %1260 = vrot.lane.b32.xlu1 %v2397_v40, %s1822_s11 }
 0x1ce   :  { %1096 = vrot.lane.b32.xlu0 %v2405_v43, %s1823_s12  ;;  %1156 = vrot.lane.b32.xlu1 %v2397_v40, %s1820_s10 }
 0x1d2   :  { %942 = vrot.lane.b32.xlu0 %v2385_v33, %s1824_s13  ;;  %1042 = vrot.lane.b32.xlu1 %v2397_v40, %s1825_s14 }
 0x1d6   :  { %994 = vrot.lane.b32.xlu0 %v2385_v33, %s1826_s15  ;;  %1094 = vrot.lane.b32.xlu1 %v2397_v40, %s1823_s12 }
 0x1da   :  { %996 = vrot.lane.b32.xlu0 %v2397_v40, %s1826_s15  ;;  %944 = vrot.lane.b32.xlu1 %v2397_v40, %s1824_s13 }
 0x1de   :  { %1592 = vperm.xlu0 %1692, %v1589_v0   ;;  %998 = vrot.lane.b32.xlu1 %v2405_v43, %s1826_s15 }
 0x1e2   :  { %1602 = vperm.xlu1 %1693, %v1599_v44  }
 0x1f1   :  { %v1201_v45 = vpop.permute.xlu0 %1200  ;;  %v1299_v46 = vpop.permute.xlu1 %1298 }
 0x1f5   :  { %v1149_v47 = vpop.permute.xlu0 %1148  ;;  %v1253_v55 = vpop.permute.xlu1 %1252 }
 0x1f9   :  { %v989_v62 = vpop.permute.xlu0 %988  ;;  %v1035_v2 = vpop.permute.xlu1 %1034 }
 0x1fa   :  { %v2444_v31 = vsel %vm2723_vm2, %v2313_v53, %v989_v62  ;;  %v2447_v6 = vsel %vm375_vm4, %v1717_v61, %v1035_v2  ;;  %v1413_v61 = vld [vmem:[#allocation5 + $0x140] sm:$0xf] }
 0x1fd   :  { %v1301_v10 = vpop.permute.xlu0 %1300  ;;  %v1087_v11 = vpop.permute.xlu1 %1086 }
 0x1fe   :  { %v1312_v56 = vsel %vm2739_vm6, %v1299_v46, %v1301_v10  ;;  %v1313_v14 = vsel %vm2736_vm0, %v1301_v10, %v1697_v7  ;;  %v1098_v53 = vsel %vm2740_vm14, %v1722_v9, %v1087_v11  ;;  %vm2745_vm0 = vcmask 916480  }
 0x1ff   :  { %v1324_v20 = vsel %vm2741_vm11, %v1312_v56, 0.0  ;;  %v1325_v21 = vsel %vm2742_vm1, %v1313_v14, 0.0  ;;  %vm2743_vm1 = vcmask 1039360   ;;  %vm2746_vm14 = vmmov %vm2745_vm0  ;;  %vm1828_vm11 = vmmov 1  }
 0x200   :  { %v1440_v24 = vpack.c.bf16 %v1410_v13, %v1325_v21  ;;  %v1439_v3 = vpack.c.bf16 %v1409_v19, %v1324_v20  ;;  %vm2744_vm6 = vmmov %vm2743_vm1 }
 0x201   :  { %v1203_v25 = vpop.permute.xlu0 %1202  ;;  %v937_v26 = vpop.permute.xlu1 %936  ;;  %vm2479_vm10 = vmpackc.low %vm1828_vm11, %vm2747_vm5  ;;  %vm2753_vm5 = vcmp.le.s32.totalorder %v2049_v18, 14 }
 0x202   :  { %v1214_v27 = vsel %vm579_vm3, %v1201_v45, %v1203_v25  ;;  %v1215_v16 = vsel %vm579_vm3, %v1203_v25, %v1702_v22  ;;  %v948_v29 = vsel %vm268_vm13, %v2316_v54, %v937_v26  ;;  %1659 = vmatprep.subr.msk.bf16.mxu1 %vm1449_vm8, %v1440_v24  ;;  %v1451_v30 = vsel %vm1449_vm8, %v1439_v3, 0  ;;  %vm1755_vm12 = vmpackc.low %vm2756_vm15, %vm1828_vm11 }
 0x203   :  { %1475 = vmatpush1.bf16.msra.mxu1 %v1451_v30  ;;  %v1718_v54 = vunpack.i.h.bf16 %v2311_v52 }
 0x205   :  { %v1151_v37 = vpop.permute.xlu0 %1150  ;;  %v1255_v38 = vpop.permute.xlu1 %1254 }
 0x206   :  { %v1162_v39 = vsel %vm2743_vm1, %v1149_v47, %v1151_v37  ;;  %v1163_v35 = vsel %vm2744_vm6, %v1151_v37, %v1712_v36  ;;  %v1266_v0 = vsel %vm2745_vm0, %v1253_v55, %v1255_v38  ;;  %v1267_v44 = vsel %vm2746_vm14, %v1255_v38, %v1707_v34  ;;  %vm1752_vm0 = vmpackc.low %vm2753_vm5, %vm1828_vm11 }
 0x207   :  { %v1747_v9 = vpack.c.bf16 %v1267_v44, %v1215_v16  ;;  %vm2750_vm1 = vcmp.ge.s32.totalorder %v2047_v17, 1  ;;  %v1750_v13 = vpack.c.bf16 %v1266_v0, %v1214_v27  ;;  %vm2754_vm14 = vcmask 7168   ;;  %v1411_v0 = vld [vmem:[#allocation5 + $0x8] sm:$0xf] }
 0x208   :  { %vm2493_vm6 = vmpackc.low %vm1828_vm11, %vm2750_vm1  ;;  %v1756_v20 = vpack.c.bf16 %v1162_v39, %v2346_v57  ;;  %v1414_v57 = vld [vmem:[#allocation5 + $0x78] sm:$0xf] }
 0x209   :  { %v1037_v45 = vpop.permute.xlu0 %1036  ;;  %v991_v46 = vpop.permute.xlu1 %990  ;;  %1748 = vmatprep.subr.msk.bf16.mxu1 %vm2479_vm10, %v1747_v9  ;;  %vm2755_vm1 = vmmov %vm2754_vm14  ;;  %v1444_v3 = vpack.c.bf16 %v1414_v57, %v2336_v4 }
 0x20a   :  { %v1047_v47 = vsel %vm375_vm4, %v1035_v2, %v1037_v45  ;;  %v2487_v55 = vsel %vm375_vm4, %v1037_v45, %v1718_v54  ;;  %v1001_v52 = vsel %vm2723_vm2, %v989_v62, %v991_v46  ;;  %1751 = vmatpush1.bf16.msk.msra.mxu1 %vm2493_vm6, %v1750_v13  ;;  %v1753_v2 = vpack.c.bf16 %v1163_v35, %v2353_v23 }
 0x20b   :  { %v1723_v62 = vunpack.i.h.bf16 %v2309_v32  ;;  %v1762_v23 = vpack.c.bf16 %v1098_v53, %v2447_v6 }
 0x20c   :  { %1754 = vmatprep.subr.msk.bf16.mxu1 %vm1752_vm0, %v1753_v2  ;;  %vm2757_vm0 = vcmp.ge.s32.totalorder %v2049_v18, 1  ;;  %v1768_v18 = vpack.c.bf16 %v2444_v31, %v948_v29 }
 0x20d   :  { %v1089_v19 = vpop.permute.xlu0 %1088  ;;  %vm1758_vm7 = vmpackc.low %vm2757_vm0, %vm2753_vm5 }
 0x20e   :  { %v1099_v56 = vsel %vm2754_vm14, %v1087_v11, %v1089_v19  ;;  %v2506_v14 = vsel %vm2755_vm1, %v1089_v19, %v1723_v62  ;;  %1757 = vmatpush1.bf16.msk.msra.mxu1 %vm1755_vm12, %v1756_v20  ;;  %vm2758_vm14 = vmmov %vm2756_vm15  ;;  %vm2759_vm1 = vcmp.ge.s32.totalorder %v2047_v17, 1  ;;  %v2531_v17 = vld [vmem:[%s2705_s4] sm:$0xf]  ;;  %vm2761_vm12 = vcmask 916480  }
 0x20f   :  { %v1759_v32 = vpack.c.bf16 %v1099_v56, %v1047_v47  ;;  %vm1761_vm2 = vmpackc.low %vm2759_vm1, %vm2758_vm14  ;;  %vm2763_vm15 = vcmask 7168   ;;  %vm2767_vm14 = vcmp.le.s32.totalorder %v2177_v5, 14  ;;  %vm2768_vm1 = vcmp.le.s32.totalorder %v2185_v12, 14 }
 0x211   :  { %v939_v21 = vpop.permute.xlu0 %938  ;;  %1760 = vmatprep.subr.msk.bf16.mxu1 %vm1758_vm7, %v1759_v32  ;;  %vm1445_vm7 = vcmask 621568  }
 0x212   :  { %v949_v24 = vsel %vm268_vm13, %v937_v26, %v939_v21  ;;  %1763 = vmatpush1.bf16.msk.msra.mxu1 %vm1761_vm2, %v1762_v23  ;;  %vm2760_vm2 = vcmask 908288  }
 0x213   :  { %v1765_v11 = vpack.c.bf16 %v1001_v52, %v949_v24  ;;  %vm2765_vm5 = vmmov %vm2760_vm2 }
 0x214   :  { %vm2766_vm0 = vmmov %vm2760_vm2 }
 0x215   :  { %1766 = vmatprep.subr.msk.bf16.mxu1 %vm2479_vm10, %v1765_v11  ;;  %vm2762_vm10 = vcmask 1039360  }
 0x216   :  { %1769 = vmatpush1.bf16.msk.msra.mxu1 %vm2493_vm6, %v1768_v18  ;;  %vm2764_vm6 = vcmask 130048  }
 0x217   :  { %1663 = vmatprep.subr.msk.bf16.mxu1 %vm1449_vm8, %v1444_v3 }
 0x219   :  { %1660 = vmatmul.mubr.msk.bf16.vlgmr.msra.gmra.mxu1 %vm1445_vm7, %v2531_v17 }
 0x21a   :  { %1581 = vmatprep.mubr.bf16.mxu1 %v1827_v15 }
 0x228   :  { %v1207_v6 = vpop.permute.xlu0 %1206  ;;  %v1305_v4 = vpop.permute.xlu1 %1304 }
 0x229   :  { %v1216_v31 = vsel %vm579_vm3, %v1702_v22, %v1207_v6  ;;  %v1314_v53 = vsel %vm2760_vm2, %v1697_v7, %v1305_v4  ;;  %vm2769_vm2 = vmmov %vm2761_vm12 }
 0x22a   :  { %v1326_v25 = vsel %vm214_vm9, %v1314_v53, 0.0 }
 0x22b   :  { %v1441_v45 = vpack.c.bf16 %v1411_v0, %v1326_v25 }
 0x22c   :  { %v1259_v26 = vpop.permute.xlu0 %1258  ;;  %v1041_v27 = vpop.permute.xlu1 %1040 }
 0x22d   :  { %v1268_v16 = vsel %vm2761_vm12, %v1707_v34, %v1259_v26  ;;  %v2547_v29 = vsel %vm375_vm4, %v1718_v54, %v1041_v27  ;;  %vm2770_vm12 = vmmov %vm2769_vm2  ;;  %v1457_v49 = vsel %vm1449_vm8, %v1441_v45, 0 }
 0x22e   :  { %v1777_v57 = vpack.c.bf16 %v1268_v16, %v1216_v31 }
 0x230   :  { %v1155_v15 = vpop.permute.xlu0 %1154  ;;  %v2549_v30 = vpop.permute.xlu1 %1725 }
 0x231   :  { %v1164_v37 = vsel %vm2762_vm10, %v1712_v36, %v1155_v15  ;;  %v1727_v22 = vunpack.i.l.bf16 %v2549_v30  ;;  %v1412_v36 = vld [vmem:[#allocation5 + $0x18] sm:$0xf] }
 0x233   :  { %v2554_v38 = vsel %vm268_vm13, %v939_v21, %v1727_v22 }
 0x234   :  { %v2556_v7 = vpop.permute.xlu0 %1092  ;;  %v2558_v39 = vpop.permute.xlu1 %992 }
 0x235   :  { %v1101_v34 = vsel %vm2763_vm15, %v1723_v62, %v2556_v7  ;;  %v2564_v35 = vsel %vm2764_vm6, %v991_v46, %v2558_v39  ;;  %vm2774_vm15 = vcmp.ge.s32.totalorder %v2177_v5, 1  ;;  %vm2777_vm6 = vcmask 1039360  }
 0x238   :  { %v1307_v44 = vpop.permute.xlu0 %1306  ;;  %v1209_v54 = vpop.permute.xlu1 %1208 }
 0x239   :  { %v1315_v9 = vsel %vm2765_vm5, %v1305_v4, %v1307_v44  ;;  %v1316_v47 = vsel %vm2766_vm0, %v1307_v44, %v1698_v58  ;;  %v1217_v52 = vsel %vm579_vm3, %v1207_v6, %v1209_v54  ;;  %v1218_v10 = vsel %vm579_vm3, %v1209_v54, %v1703_v42  ;;  %vm2778_vm5 = vmmov %vm2777_vm6 }
 0x23a   :  { %v1327_v46 = vsel %vm2767_vm14, %v1315_v9, 0.0  ;;  %v1328_v13 = vsel %vm2768_vm1, %v1316_v47, 0.0  ;;  %vm2771_vm3 = vcmp.ge.s32.totalorder %v2195_v28, 1  ;;  %vm2779_vm0 = vcmp.ge.s32.totalorder %v2168_v59, 1 }
 0x23b   :  { %v1442_v2 = vpack.c.bf16 %v1412_v36, %v1327_v46  ;;  %v1443_v62 = vpack.c.bf16 %v1413_v61, %v1328_v13  ;;  %vm2588_vm10 = vmpackc.low %vm1828_vm11, %vm2771_vm3  ;;  %vm2782_vm1 = vcmp.ge.s32.totalorder %v2185_v12, 1  ;;  %v1614_v36 = vstv %s2706_s7 }
 0x23c   :  { %v1045_v19 = vpop.permute.xlu0 %1044  ;;  %v1261_v56 = vpop.permute.xlu1 %1260  ;;  %vm2612_vm14 = vmpackc.low %vm1828_vm11, %vm2779_vm0  ;;  %vm2787_vm0 = vcmp.le.s32.totalorder %v2185_v12, 14 }
 0x23d   :  { %v1269_v48 = vsel %vm2769_vm2, %v1259_v26, %v1261_v56  ;;  %v1270_v58 = vsel %vm2770_vm12, %v1261_v56, %v1708_v63  ;;  %1661 = vmatprep.subr.msk.bf16.mxu0 %vm1449_vm8, %v1442_v2  ;;  %v1463_v42 = vsel %vm1449_vm8, %v1443_v62, 0  ;;  %vm2599_vm8 = vmpackc.low %vm1828_vm11, %vm2774_vm15  ;;  %vm2785_vm12 = vcmp.le.s32.totalorder %v2195_v28, 14 }
 0x23e   :  { %1516 = vmatpush1.bf16.msra.mxu0 %v1457_v49  ;;  %1556 = vmatpush1.bf16.msra.mxu1 %v1463_v42  ;;  %v1774_v32 = vpack.c.bf16 %v1269_v48, %v1217_v52  ;;  %vm2621_vm2 = vmpackc.low %vm1828_vm11, %vm2782_vm1  ;;  %v1780_v51 = vpack.c.bf16 %v1270_v58, %v1218_v10  ;;  %vm2786_vm15 = vcmp.le.s32.totalorder %v2177_v5, 14 }
 0x23f   :  { %1772 = vmatprep.subr.msk.bf16.mxu1 %vm2588_vm10, %v1771_v50  ;;  %vm1782_vm3 = vmpackc.low %vm2785_vm12, %vm1828_vm11  ;;  %vm2789_vm12 = vcmp.ge.s32.totalorder %v2177_v5, 1  ;;  %v1798_v5 = vpack.c.bf16 %v2506_v14, %v2487_v55  ;;  %v1807_v55 = vpack.c.bf16 %v2564_v35, %v2554_v38 }
 0x240   :  { %v1097_v63 = vpop.permute.xlu0 %1096  ;;  %v1157_v21 = vpop.permute.xlu1 %1156  ;;  %1775 = vmatprep.subr.msk.bf16.mxu0 %vm2599_vm8, %v1774_v32  ;;  %vm1791_vm1 = vmpackc.low %vm2787_vm0, %vm1828_vm11 }
 0x241   :  { %v1165_v23 = vsel %vm2777_vm6, %v1155_v15, %v1157_v21  ;;  %v1166_v41 = vsel %vm2778_vm5, %v1157_v21, %v1713_v60  ;;  %v1783_v60 = vpack.c.bf16 %v2332_v1, %v2405_v43  ;;  %vm1785_vm6 = vmpackc.low %vm2786_vm15, %vm1828_vm11  ;;  %v1789_v1 = vpack.c.bf16 %v1164_v37, %v2405_v43 }
 0x242   :  { %1778 = vmatpush1.bf16.msk.msra.mxu0 %vm2612_vm14, %v1777_v57  ;;  %1781 = vmatpush1.bf16.msk.msra.mxu1 %vm2621_vm2, %v1780_v51  ;;  %v1786_v53 = vpack.c.bf16 %v1165_v23, %v2385_v33  ;;  %vm1788_vm5 = vmpackc.low %vm214_vm9, %vm1828_vm11  ;;  %v1792_v25 = vpack.c.bf16 %v1166_v41, %v2397_v40  ;;  %v1795_v33 = vpack.c.bf16 %v1101_v34, %v2547_v29  ;;  %v1728_v40 = vunpack.i.h.bf16 %v2549_v30 }
 0x243   :  { %1784 = vmatprep.subr.msk.bf16.mxu1 %vm1782_vm3, %v1783_v60 }
 0x244   :  { %v943_v3 = vpop.permute.xlu0 %942  ;;  %v1043_v18 = vpop.permute.xlu1 %1042  ;;  %1787 = vmatprep.subr.msk.bf16.mxu0 %vm1785_vm6, %v1786_v53  ;;  %vm2791_vm6 = vcmask 7168  }
 0x245   :  { %v951_v6 = vsel %vm268_vm13, %v1727_v22, %v943_v3  ;;  %v1050_v4 = vsel %vm375_vm4, %v1041_v27, %v1043_v18  ;;  %v1051_v31 = vsel %vm375_vm4, %v1043_v18, %v1045_v19  ;;  %vm2788_vm4 = vmmov %vm2786_vm15  ;;  %vm2790_vm15 = vcmask 130048  }
 0x246   :  { %1790 = vmatpush1.bf16.msk.msra.mxu0 %vm1788_vm5, %v1789_v1  ;;  %1793 = vmatpush1.bf16.msk.msra.mxu1 %vm1791_vm1, %v1792_v25  ;;  %vm1794_vm3 = vmpackc.low %vm2789_vm12, %vm2788_vm4  ;;  %vm2793_vm5 = vcmp.ge.s32.totalorder %v2168_v59, 1  ;;  %vm2796_vm4 = vcmp.ge.s32.totalorder %v2195_v28, 1 }
 0x247   :  { %1796 = vmatprep.subr.msk.bf16.mxu0 %vm1794_vm3, %v1795_v33  ;;  %vm2792_vm11 = vmmov %vm2791_vm6  ;;  %vm2798_vm3 = vcmp.ge.s32.totalorder %v2185_v12, 1 }
 0x248   :  { %v995_v26 = vpop.permute.xlu0 %994  ;;  %v1095_v27 = vpop.permute.xlu1 %1094  ;;  %vm1797_vm0 = vmpackc.low %vm2793_vm5, %vm214_vm9  ;;  %vm2795_vm9 = vcmp.le.s32.totalorder %v2195_v28, 14 }
 0x249   :  { %v1003_v43 = vsel %vm2790_vm15, %v2558_v39, %v995_v26  ;;  %v1102_v16 = vsel %vm2791_vm6, %v2556_v7, %v1095_v27  ;;  %v1103_v15 = vsel %vm2792_vm11, %v1095_v27, %v1097_v63  ;;  %vm2794_vm1 = vmmov %vm2790_vm15 }
 0x24a   :  { %1799 = vmatpush1.bf16.msk.msra.mxu0 %vm1797_vm0, %v1798_v5  ;;  %v1801_v22 = vpack.c.bf16 %v1003_v43, %v951_v6  ;;  %vm1803_vm12 = vmpackc.low %vm2796_vm4, %vm2795_vm9  ;;  %v1804_v59 = vpack.c.bf16 %v1103_v15, %v1051_v31  ;;  %v1810_v14 = vpack.c.bf16 %v1102_v16, %v1050_v4 }
 0x24c   :  { %v997_v29 = vpop.permute.xlu0 %996  ;;  %v945_v37 = vpop.permute.xlu1 %944  ;;  %1802 = vmatprep.subr.msk.bf16.mxu0 %vm2599_vm8, %v1801_v22  ;;  %1805 = vmatprep.subr.msk.bf16.mxu1 %vm1803_vm12, %v1804_v59  ;;  %vm2797_vm8 = vcmp.le.s32.totalorder %v2185_v12, 14 }
 0x24d   :  { %v1004_v7 = vsel %vm2794_vm1, %v995_v26, %v997_v29  ;;  %v952_v39 = vsel %vm268_vm13, %v943_v3, %v945_v37  ;;  %v953_v34 = vsel %vm268_vm13, %v945_v37, %v1728_v40  ;;  %vm1809_vm15 = vmpackc.low %vm2798_vm3, %vm2797_vm8 }
 0x24e   :  { %1808 = vmatpush1.bf16.msk.msra.mxu0 %vm2612_vm14, %v1807_v55  ;;  %1811 = vmatpush1.bf16.msk.msra.mxu1 %vm1809_vm15, %v1810_v14  ;;  %vm2799_vm13 = vmmov %vm2794_vm1  ;;  %v1816_v38 = vpack.c.bf16 %v1004_v7, %v952_v39 }
 0x250   :  { %v999_v30 = vpop.permute.xlu1 %998 }
 0x251   :  { %v1005_v0 = vsel %vm2799_vm13, %v997_v29, %v999_v30  ;;  %1662 = vmatmul.mubr.msk.bf16.vlgmr.msra.gmra.mxu0 %vm1445_vm7, %v2531_v17 }
 0x252   :  { %v1813_v28 = vpack.c.bf16 %v1005_v0, %v953_v34 }
 0x254   :  { %1814 = vmatprep.subr.msk.bf16.mxu1 %vm2588_vm10, %v1813_v28 }
 0x255   :  { %1817 = vmatpush1.bf16.msk.msra.mxu1 %vm2621_vm2, %v1816_v38 }
 0x258   :  { %1664 = vmatmul.mubr.msk.bf16.vlgmr.msra.gmra.mxu1 %vm1445_vm7, %v2531_v17 }
 0x259   :  { %v1593_v12 = vpop.permute.xlu0 %1592 }
 0x25d   :  { %v1603_v54 = vpop.permute.xlu1 %1602 }
 0x2d9   :  { %v1502_v35 = vpop.f32.mrf.mxu1 }
 0x2da   :  { %v1595_v44 = vmul.f32 %v1593_v12, %v1502_v35 }
 0x2db   :  { %v1504_v45 = vpop.f32.mrf.mxu1 }
 0x2dc   :  { %v1605_v61 = vadd.f32 %v1603_v54, %v1595_v44  ;;  %v1596_v9 = vmul.f32 %v1593_v12, %v1504_v45 }
 0x2dd   :  { %v1506_v47 = vpop.f32.mrf.mxu1 }
 0x2de   :  { %v1615_v52 = vmul.f32 %v1614_v36, %v1605_v61  ;;  %v1606_v10 = vadd.f32 %v1603_v54, %v1596_v9  ;;  %vm1610_vm10 = vcmp.ge.f32.partialorder %v1605_v61, 0.0 }
 0x2df   :  { %v1507_v46 = vpop.f32.mrf.mxu1 }
 0x2e0   :  { %vm1611_vm14 = vcmp.ge.f32.partialorder %v1606_v10, 0.0  ;;  %v1616_v13 = vmul.f32 %v1614_v36, %v1606_v10  ;;  %v1619_v2 = vsel %vm1610_vm10, %v1605_v61, %v1615_v52 }
 0x2e2   :  { %v1620_v17 = vsel %vm1611_vm14, %v1606_v10, %v1616_v13 }
 0x2e3   :  { %v1668_v62 = vpack.c.bf16 %v1620_v17, %v1619_v2 }
 0x2e5   :  { %1631 = vst [vmem:[%s2707_s8] sm:$0xff] %v1668_v62 }
 0x311   :  { %v1543_v19 = vpop.f32.mrf.mxu0 }
 0x313   :  { %v1544_v56 = vpop.f32.mrf.mxu0 }
 0x314   :  { %v1597_v48 = vmul.f32 %v1593_v12, %v1544_v56 }
 0x315   :  { %v1546_v58 = vpop.f32.mrf.mxu0 }
 0x316   :  { %v1607_v49 = vadd.f32 %v1603_v54, %v1597_v48 }
 0x317   :  { %v1547_v42 = vpop.f32.mrf.mxu0 }
 0x318   :  { %v1583_v20 = vpop.f32.mrf.mxu1  ;;  %v1617_v21 = vmul.f32 %v1614_v36, %v1607_v49  ;;  %vm1612_vm7 = vcmp.ge.f32.partialorder %v1607_v49, 0.0 }
 0x319   :  { %v1598_v50 = vmul.f32 %v1593_v12, %v1583_v20 }
 0x31a   :  { %v1585_v63 = vpop.f32.mrf.mxu1  ;;  %v1621_v8 = vsel %vm1612_vm7, %v1607_v49, %v1617_v21 }
 0x31b   :  { %v1608_v24 = vadd.f32 %v1603_v54, %v1598_v50 }
 0x31c   :  { %v1586_v32 = vpop.f32.mrf.mxu1 }
 0x31d   :  { %vm1613_vm2 = vcmp.ge.f32.partialorder %v1608_v24, 0.0  ;;  %v1618_v23 = vmul.f32 %v1614_v36, %v1608_v24 }
 0x31e   :  { %v1587_v41 = vpop.f32.mrf.mxu1 }
 0x31f   :  { %v1622_v57 = vsel %vm1613_vm2, %v1608_v24, %v1618_v23 }
 0x320   :  { %v1669_v11 = vpack.c.bf16 %v1622_v57, %v1621_v8 }
 0x322   :  { %1667 = vst [vmem:[%s2707_s8 + $0x8] sm:$0xff] %v1669_v11 }

</bundles_post_ra>
